<compile_context>
chip_gen: v7x
topology: tpu7x:2x2x1
jax: 0.10.0
libtpu: 0.0.40
codegen_flags: <defaults>
</compile_context>

<pallas_src>
import functools

import jax
import jax.numpy as jnp
from jax.experimental import pallas as pl
from jax.experimental.pallas import tpu as pltpu


# ---------------------------------------------------------------------------
# Kernel
# ---------------------------------------------------------------------------
def mil_kernel(x_ref, w1_ref, b1_ref, w234_ref, b234_ref, o_ref):
    # In-kernel cast of the x tile to the MXU operand dtype (no-op when the
    # weights were prepared in f32).  Layer 1: Linear(1024 -> 512) + ReLU,
    # MXU matmul with f32 accumulation; bias add + ReLU in f32.
    xt = x_ref[...].astype(w1_ref.dtype)
    h = jnp.dot(xt, w1_ref[...], preferred_element_type=jnp.float32)
    h = jnp.maximum(h + b1_ref[...], 0.0)

    # Fused layers 2-4: Linear(512 -> 1) done as VPU multiply + lane reduction
    # (keeps the MXU free, stays entirely in f32).  w234_ref is a (1, 512) row.
    logit = jnp.sum(h * w234_ref[...], axis=-1, keepdims=True) + b234_ref[...]
    o_ref[...] = jax.nn.sigmoid(logit).astype(o_ref.dtype)


# ---------------------------------------------------------------------------
# One-time parameter preparation (model-load time, NOT on the per-call path)
# ---------------------------------------------------------------------------
def _fuse_tail(params, precision=None):
    """Fold the bias-only chain L2 -> L3 -> L4 into a single (512, 1) projection."""
    w234 = jnp.dot(jnp.dot(params["w2"], params["w3"], precision=precision),
                   params["w4"], precision=precision)
    b234 = jnp.dot(jnp.dot(params["b2"], params["w3"], precision=precision)
                   + params["b3"],
                   params["w4"], precision=precision) + params["b4"]
    return w234, b234


def prepare_params(params, compute_dtype=jnp.bfloat16):
    """Fuse layers 2-4 at HIGHEST precision and cast weights once.

    Returns arrays ready to feed straight into `mil_forward`:
      w1:        (in_dim, 512) in `compute_dtype` (MXU operand dtype)
      b1:        (1, 512)      f32
      w234_row:  (1, 512)      f32 (tail projection stays off the MXU, in f32)
      b234:      (1, 1)        f32
    """
    P = jax.lax.Precision.HIGHEST
    w234, b234 = _fuse_tail(params, precision=P)      # (512, 1), (1, 1)
    return {
        "w1": params["w1"].astype(compute_dtype),
        "b1": params["b1"].astype(jnp.float32),
        "w234_row": w234.T.astype(jnp.float32),
        "b234": b234.astype(jnp.float32),
    }


# ---------------------------------------------------------------------------
# Forward wrapper
# ---------------------------------------------------------------------------
def _round_up(v, m):
    return (v + m - 1) // m * m


def _vmem_budget_bytes(tm_eff, in_dim, h1, out_dim, x_itemsize, w_itemsize):
    x_stream = 2 * tm_eff * in_dim * x_itemsize                      # x tile, double-buffered
    weights = 2 * (in_dim * h1 * w_itemsize + (2 * h1 + 1) * 4)      # w1/b1/w234_row/b234
    interm = tm_eff * h1 * 4                                         # f32 hidden activations
    if w_itemsize < x_itemsize:                                      # in-kernel bf16 copy of x
        interm += tm_eff * in_dim * w_itemsize
    out = 2 * tm_eff * out_dim * 4
    est = x_stream + weights + interm + out + (8 << 20)              # + compiler scratch margin
    return int(min(max(est, 16 << 20), 56 << 20))


@functools.partial(jax.jit, static_argnames=("tm",))
def mil_forward(x, w1, b1, w234_row, b234, *, tm=2048):
    """x: [N, 1024] f32 (or bf16).  Weights come from `prepare_params` (already
    fused and cast) so the per-call path is the pallas_call only."""
    N, in_dim = x.shape
    h1 = w1.shape[1]
    out_dim = b234.shape[1]
    out_dtype = x.dtype

    # Batch tile: large for MXU / pipeline efficiency.
    #  * N <= tm      -> one resident grid step (serving latency path).
    #  * tm < N <= 2tm -> two balanced steps so both v7x TCs get work.
    #  * else          -> full tm tiles.
    tm_req = max(_round_up(tm, 8), 8)
    n_pad = max(_round_up(N, 8), 8)
    if n_pad <= tm_req:
        tm_eff = n_pad
    elif n_pad <= 2 * tm_req:
        tm_eff = _round_up(pl.cdiv(n_pad, 2), 8)
    else:
        tm_eff = tm_req
    grid = (pl.cdiv(N, tm_eff),)

    vmem_limit = _vmem_budget_bytes(
        tm_eff, in_dim, h1, out_dim,
        jnp.dtype(x.dtype).itemsize, jnp.dtype(w1.dtype).itemsize)

    full = lambda shape: pl.BlockSpec(shape, lambda i: tuple(0 for _ in shape))

    return pl.pallas_call(
        mil_kernel,
        out_shape=jax.ShapeDtypeStruct((N, out_dim), out_dtype),
        grid_spec=pltpu.PrefetchScalarGridSpec(
            num_scalar_prefetch=0,
            grid=grid,
            in_specs=[
                pl.BlockSpec((tm_eff, in_dim), lambda i: (i, 0)),   # x tile (f32, cast in-kernel)
                full((in_dim, h1)),                                  # w1 (resident)
                full((1, h1)),                                       # b1 (resident)
                full((1, h1)),                                       # w234 row (resident, f32)
                full((1, out_dim)),                                  # b234 (resident, f32)
            ],
            out_specs=pl.BlockSpec((tm_eff, out_dim), lambda i: (i, 0)),
        ),
        compiler_params=pltpu.CompilerParams(
            dimension_semantics=("parallel",),     # shards batch axis across TCs (v7x)
            vmem_limit_bytes=vmem_limit,
        ),
    )(x, w1, b1, w234_row, b234)


# ---------------------------------------------------------------------------
# Reference + init (for the self-contained check)
# ---------------------------------------------------------------------------
def init_params(key, input_dim=1024, h1=512, h2=256, h3=32, out_dim=1,
                bias_scale=0.0):
    """Xavier-normal weights stored transposed as [in, out]; biases zero by
    default (matching MILModel._init_weights).  bias_scale > 0 is a test-only
    knob so the bias-fusion path is actually exercised numerically."""
    dims = [(input_dim, h1), (h1, h2), (h2, h3), (h3, out_dim)]
    params = {}
    for idx, (fan_in, fan_out) in enumerate(dims, start=1):
        key, kw, kb = jax.random.split(key, 3)
        std = (2.0 / (fan_in + fan_out)) ** 0.5
        params[f"w{idx}"] = std * jax.random.normal(
            kw, (fan_in, fan_out), dtype=jnp.float32)
        params[f"b{idx}"] = bias_scale * jax.random.normal(
            kb, (1, fan_out), dtype=jnp.float32)
    return params


def reference_forward(x, params):
    """Original 4-layer forward in pure JAX at HIGHEST matmul precision."""
    P = jax.lax.Precision.HIGHEST
    h = jnp.maximum(jnp.dot(x, params["w1"], precision=P) + params["b1"], 0.0)
    h = jnp.dot(h, params["w2"], precision=P) + params["b2"]
    h = jnp.dot(h, params["w3"], precision=P) + params["b3"]
    return jax.nn.sigmoid(jnp.dot(h, params["w4"], precision=P) + params["b4"])


if __name__ == "__main__":
    key = jax.random.PRNGKey(0)
    k_param, k_x = jax.random.split(key)

    N, INPUT_DIM = 16, 1024  # small serving-style batch; feature dims fixed by the module
    raw_params = init_params(k_param, input_dim=INPUT_DIM, bias_scale=0.1)
    x = jax.random.normal(k_x, (N, INPUT_DIM), dtype=jnp.float32)

    ref = reference_forward(x, raw_params)

    # 1) Tight pure-JAX check of the layer-2..4 fusion algebra (no Pallas, f32 HIGHEST).
    P = jax.lax.Precision.HIGHEST
    w234_hp, b234_hp = _fuse_tail(raw_params, precision=P)
    h_hp = jnp.maximum(jnp.dot(x, raw_params["w1"], precision=P) + raw_params["b1"], 0.0)
    fused_ref = jax.nn.sigmoid(jnp.dot(h_hp, w234_hp, precision=P) + b234_hp)
    assert jnp.allclose(fused_ref, ref, atol=1e-5, rtol=1e-5), "fusion algebra mismatch"

    # 2) Kernel, f32 weight path (validation; in-kernel cast is a no-op).
    p_f32 = prepare_params(raw_params, compute_dtype=jnp.float32)
    out_f32 = jax.block_until_ready(mil_forward(x, **p_f32))
    assert out_f32.shape == (N, 1), out_f32.shape
    assert jnp.allclose(out_f32, ref, atol=1e-2, rtol=1e-2), "f32 kernel mismatch"

    # 3) Kernel, bf16 MXU-operand path (default / performance path).
    p_bf16 = prepare_params(raw_params, compute_dtype=jnp.bfloat16)
    out_bf16 = jax.block_until_ready(mil_forward(x, **p_bf16))
    assert out_bf16.shape == (N, 1), out_bf16.shape
    assert jnp.allclose(out_bf16, ref, atol=3e-2, rtol=3e-2), "bf16 kernel mismatch"

    print("KERNEL_OK")
</pallas_src>

<mosaic_0001>
module attributes {stable_mosaic.version = 11 : i64} {
  func.func @mil_kernel(%arg0: i32, %arg1: memref<16x1024xf32, #tpu.memory_space<vmem>>, %arg2: memref<1024x512xf32, #tpu.memory_space<vmem>>, %arg3: memref<1x512xf32, #tpu.memory_space<vmem>>, %arg4: memref<1x512xf32, #tpu.memory_space<vmem>>, %arg5: memref<1x1xf32, #tpu.memory_space<vmem>>, %arg6: memref<16x1xf32, #tpu.memory_space<vmem>>) attributes {dimension_semantics = [#tpu.dimension_semantics<parallel>], iteration_bounds = array<i64: 1>, scalar_prefetch = 0 : i64, scratch_operands = 0 : i64, tpu.core_type = #tpu.core_type<tc>, window_params = [{transform_indices = @transform_0, window_bounds = array<i64: 16, 1024>}, {pipeline_mode = #tpu.pipeline_mode<synchronous>, transform_indices = @transform_1, window_bounds = array<i64: 1024, 512>}, {pipeline_mode = #tpu.pipeline_mode<synchronous>, transform_indices = @transform_2, window_bounds = array<i64: 1, 512>}, {pipeline_mode = #tpu.pipeline_mode<synchronous>, transform_indices = @transform_3, window_bounds = array<i64: 1, 512>}, {pipeline_mode = #tpu.pipeline_mode<synchronous>, transform_indices = @transform_4, window_bounds = array<i64: 1, 1>}, {transform_indices = @transform_5, window_bounds = array<i64: 16, 1>}]} {
    %c0 = arith.constant 0 : index
    %c0_0 = arith.constant 0 : index
    %0 = vector.load %arg1[%c0, %c0_0] : memref<16x1024xf32, #tpu.memory_space<vmem>>, vector<16x1024xf32>
    %c0_1 = arith.constant 0 : index
    %c0_2 = arith.constant 0 : index
    %1 = vector.load %arg2[%c0_1, %c0_2] : memref<1024x512xf32, #tpu.memory_space<vmem>>, vector<1024x512xf32>
    %cst = arith.constant dense<0.000000e+00> : vector<16x512xf32>
    %2 = tpu.matmul %0, %1, %cst {dimension_numbers = #tpu.dot_dimension_numbers<[1], [0], [0], [1], [0, 0, 1, 1], [], []>} : vector<16x1024xf32>, vector<1024x512xf32>, vector<16x512xf32> -> vector<16x512xf32>
    %c0_3 = arith.constant 0 : index
    %c0_4 = arith.constant 0 : index
    %3 = vector.load %arg3[%c0_3, %c0_4] : memref<1x512xf32, #tpu.memory_space<vmem>>, vector<1x512xf32>
    %4 = vector.broadcast %3 : vector<1x512xf32> to vector<16x512xf32>
    %5 = arith.addf %2, %4 : vector<16x512xf32>
    %cst_5 = arith.constant 0.000000e+00 : f32
    %6 = vector.broadcast %cst_5 : f32 to vector<16x512xf32>
    %7 = arith.maximumf %5, %6 : vector<16x512xf32>
    %c0_6 = arith.constant 0 : index
    %c0_7 = arith.constant 0 : index
    %8 = vector.load %arg4[%c0_6, %c0_7] : memref<1x512xf32, #tpu.memory_space<vmem>>, vector<1x512xf32>
    %9 = vector.broadcast %8 : vector<1x512xf32> to vector<16x512xf32>
    %10 = arith.mulf %7, %9 : vector<16x512xf32>
    %cst_8 = arith.constant dense<0.000000e+00> : vector<16xf32>
    %11 = vector.multi_reduction <add>, %10, %cst_8 [1] : vector<16x512xf32> to vector<16xf32>
    %12 = vector.shape_cast %11 : vector<16xf32> to vector<16x1xf32>
    %c0_9 = arith.constant 0 : index
    %c0_10 = arith.constant 0 : index
    %13 = vector.load %arg5[%c0_9, %c0_10] : memref<1x1xf32, #tpu.memory_space<vmem>>, vector<1x1xf32>
    %14 = vector.broadcast %13 : vector<1x1xf32> to vector<16x1xf32>
    %15 = arith.addf %12, %14 : vector<16x1xf32>
    %16 = arith.negf %15 : vector<16x1xf32>
    %17 = math.exp %16 : vector<16x1xf32>
    %cst_11 = arith.constant 1.000000e+00 : f32
    %18 = vector.broadcast %cst_11 : f32 to vector<16x1xf32>
    %19 = arith.addf %18, %17 : vector<16x1xf32>
    %20 = arith.divf %18, %19 : vector<16x1xf32>
    %c0_12 = arith.constant 0 : index
    %c0_13 = arith.constant 0 : index
    %21 = vector.load %arg6[%c0_12, %c0_13] : memref<16x1xf32, #tpu.memory_space<vmem>>, vector<16x1xf32>
    tpu.vector_store %arg6[%c0_12, %c0_13], %20 {strides = array<i32>} : memref<16x1xf32, #tpu.memory_space<vmem>>, vector<16x1xf32>,
    return
  }
  func.func @transform_0(%arg0: i32) -> (i32, i32) {
    %c0_i32 = arith.constant 0 : i32
    %c0_i32_0 = arith.constant 0 : i32
    return %arg0, %c0_i32 : i32, i32
  }
  func.func @transform_1(%arg0: i32) -> (i32, i32) {
    %c0_i32 = arith.constant 0 : i32
    %c0_i32_0 = arith.constant 0 : i32
    %c0_i32_1 = arith.constant 0 : i32
    return %c0_i32, %c0_i32_0 : i32, i32
  }
  func.func @transform_2(%arg0: i32) -> (i32, i32) {
    %c0_i32 = arith.constant 0 : i32
    %c0_i32_0 = arith.constant 0 : i32
    %c0_i32_1 = arith.constant 0 : i32
    return %c0_i32, %c0_i32_0 : i32, i32
  }
  func.func @transform_3(%arg0: i32) -> (i32, i32) {
    %c0_i32 = arith.constant 0 : i32
    %c0_i32_0 = arith.constant 0 : i32
    %c0_i32_1 = arith.constant 0 : i32
    return %c0_i32, %c0_i32_0 : i32, i32
  }
  func.func @transform_4(%arg0: i32) -> (i32, i32) {
    %c0_i32 = arith.constant 0 : i32
    %c0_i32_0 = arith.constant 0 : i32
    %c0_i32_1 = arith.constant 0 : i32
    return %c0_i32, %c0_i32_0 : i32, i32
  }
  func.func @transform_5(%arg0: i32) -> (i32, i32) {
    %c0_i32 = arith.constant 0 : i32
    %c0_i32_0 = arith.constant 0 : i32
    return %arg0, %c0_i32 : i32, i32
  }
}

</mosaic_0001>

<bundles_post_ra>
// kernel: mil_forward.1
= control target key start
LH: loop header
LB: loop body
LE: loop exit
PB: predicated region body
PF: predicated region fallthrough
CT: control target
= control target key end

     0   :  { %s2070_s0 = inlined_call_operand.hbm [shape: f32[16,1024], index: 0, kind: input, shape index: {}]   ;;  %s2071_s1 = inlined_call_operand.hbm [shape: f32[1024,512], index: 1, kind: input, shape index: {}]   ;;  %s2072_s2 = inlined_call_operand.hbm [shape: f32[1,512], index: 2, kind: input, shape index: {}]   ;;  %s2073_s3 = inlined_call_operand.hbm [shape: f32[1,512], index: 3, kind: input, shape index: {}]   ;;  %s2074_s4 = inlined_call_operand.<no memory space> [shape: f32[1,1], index: 4, kind: input, shape index: {}]   ;;  %s2075_s5 = inlined_call_operand.vmem [shape: f32[16,1], index: 5, kind: output, shape index: {}]  }
   0x1   :  { %v10_v0 = vstv %s2074_s4 }
   0x2   :  { %11 = vst [vmem:[#allocation2] sm:$0x1] %v10_v0 }
   0x3   :  { %12 = vsyncpa [#allocation4], 0 }
   0x4   :  { %13 = vsyncpa [#allocation6], 0 }
   0x5   :  { %14 = vsyncpa [#allocation9], 0  ;;  %s1975_s20 = smov [#allocation5]   ;;  %s1881_s24 = scalar_lea.hbm %s2071_s1, 65536 }
   0x6   :  { %s32_s21 = sshll.u32 %s1975_s20, 4  ;;  %p1882_p0 = scmp.ne.s32.totalorder %s2071_s1, %s1881_s24  ;;  %s33_s21 = int_to_ptr.vmem [resolvable:$true] %s32_s21 }
   0x7   :  { %p1885_p1 = scmp.lt.u32.totalorder %s1881_s24, %s2071_s1 }
   0x9   :  { %p1887_p2 = pnand %p1885_p1, %p1882_p0 }
   0xb   :  { %1890 = shalt.err (!%p1887_p2)
}
   0xc   :  { %s1891_s4 = scalar_lea.vmem %s33_s21, 65536  ;;  %p1896_p4 = scmp.lt.s32.totalorder %s33_s21, %s33_s21 }
   0xd   :  { %p1892_p3 = scmp.ne.s32.totalorder %s33_s21, %s1891_s4  ;;  %p1897_p5 = scmp.lt.s32.totalorder %s1891_s4, %s1891_s4 }
   0xf   :  { %p1898_p6 = por %p1897_p5, %p1896_p4 }
  0x11   :  { %p1899_p7 = pnand %p1898_p6, %p1892_p3 }
  0x13   :  { %1902 = shalt.err (!%p1899_p7)
}
  0x14   :  { %s1976_s29 = smov 512   ;;  %s1977_s30 = smov 32  }
  0x15   :  { %38 = dma.hbm_to_vmem [thread:$0]  %s2071_s1, 65536, %s33_s21, [#allocation6], %s1976_s29, %s1976_s29, %s1977_s30  }
  0x16   :  { %s1978_s8 = smov [#allocation3]   ;;  %s1903_s12 = scalar_lea.hbm %s2070_s0, 2048 }
  0x17   :  { %s20_s9 = sshll.u32 %s1978_s8, 4  ;;  %p1904_p8 = scmp.ne.s32.totalorder %s2070_s0, %s1903_s12  ;;  %s21_s9 = int_to_ptr.vmem [resolvable:$true] %s20_s9 }
  0x18   :  { %p1907_p9 = scmp.lt.u32.totalorder %s1903_s12, %s2070_s0 }
  0x1a   :  { %p1909_p10 = pnand %p1907_p9, %p1904_p8 }
  0x1c   :  { %1912 = shalt.err (!%p1909_p10)
}
  0x1d   :  { %s1913_s17 = scalar_lea.vmem %s21_s9, 2048  ;;  %p1918_p12 = scmp.lt.s32.totalorder %s21_s9, %s21_s9 }
  0x1e   :  { %p1914_p11 = scmp.ne.s32.totalorder %s21_s9, %s1913_s17  ;;  %p1919_p13 = scmp.lt.s32.totalorder %s1913_s17, %s1913_s17 }
  0x20   :  { %p1920_p0 = por %p1919_p13, %p1918_p12 }
  0x22   :  { %p1921_p1 = pnand %p1920_p0, %p1914_p11 }
  0x24   :  { %1924 = shalt.err (!%p1921_p1)
}
  0x25   :  { %s1979_s1 = smov 1024   ;;  %s1980_s18 = smov 64  }
  0x26   :  { %26 = dma.hbm_to_vmem [thread:$0]  %s2070_s0, 2048, %s21_s9, [#allocation4], %s1979_s1, %s1979_s1, %s1980_s18  }
  0x27   :  { %s1981_s21 = smov [#allocation7]   ;;  %s1982_s23 = smov [#allocation8]  }
  0x28   :  { %s45_s22 = sshll.u32 %s1981_s21, 4  ;;  %s55_s24 = sshll.u32 %s1982_s23, 4  ;;  %s46_s22 = int_to_ptr.vmem [resolvable:$true] %s45_s22  ;;  %s56_s24 = int_to_ptr.vmem [resolvable:$true] %s55_s24 }
  0x29   :  { %s1925_s27 = scalar_lea.hbm %s2072_s2, 64 }
  0x2a   :  { %p1926_p2 = scmp.ne.s32.totalorder %s2072_s2, %s1925_s27  ;;  %p1929_p3 = scmp.lt.u32.totalorder %s1925_s27, %s2072_s2 }
  0x2c   :  { %p1931_p4 = pnand %p1929_p3, %p1926_p2 }
  0x2e   :  { %1934 = shalt.err (!%p1931_p4)
}
  0x2f   :  { %s1935_s0 = scalar_lea.vmem %s46_s22, 64  ;;  %p1940_p6 = scmp.lt.s32.totalorder %s46_s22, %s46_s22 }
  0x30   :  { %p1936_p5 = scmp.ne.s32.totalorder %s46_s22, %s1935_s0  ;;  %p1941_p7 = scmp.lt.s32.totalorder %s1935_s0, %s1935_s0 }
  0x32   :  { %p1942_p8 = por %p1941_p7, %p1940_p6 }
  0x34   :  { %p1943_p9 = pnand %p1942_p8, %p1936_p5 }
  0x36   :  { %1946 = shalt.err (!%p1943_p9)
}
  0x37   :  { %48 = dma.hbm_to_vmem [thread:$0]  %s2072_s2, 64, %s46_s22, [#allocation6]  }
  0x38   :  { %s1947_s10 = scalar_lea.hbm %s2073_s3, 64 }
  0x39   :  { %p1948_p10 = scmp.ne.s32.totalorder %s2073_s3, %s1947_s10  ;;  %p1951_p11 = scmp.lt.u32.totalorder %s1947_s10, %s2073_s3 }
  0x3b   :  { %p1953_p12 = pnand %p1951_p11, %p1948_p10 }
  0x3d   :  { %1956 = shalt.err (!%p1953_p12)
}
  0x3e   :  { %s1957_s15 = scalar_lea.vmem %s56_s24, 64  ;;  %p1962_p0 = scmp.lt.s32.totalorder %s56_s24, %s56_s24 }
  0x3f   :  { %p1958_p13 = scmp.ne.s32.totalorder %s56_s24, %s1957_s15  ;;  %p1963_p1 = scmp.lt.s32.totalorder %s1957_s15, %s1957_s15 }
  0x41   :  { %p1964_p2 = por %p1963_p1, %p1962_p0 }
  0x43   :  { %p1965_p3 = pnand %p1964_p2, %p1958_p13 }
  0x45   :  { %1968 = shalt.err (!%p1965_p3)
}
  0x46   :  { %58 = dma.hbm_to_vmem [thread:$0]  %s2073_s3, 64, %s56_s24, [#allocation9]  }
  0x47   :  { %1969 = dma.done.wait [#allocation4], 2048  }
  0x48   :  { %1970 = vsyncadd [#allocation4], 4294965248 }
  0x49   :  { %1971 = dma.done.wait [#allocation6], 65600  }
  0x4a   :  { %1972 = vsyncadd [#allocation6], 4294901696 }
  0x4b   :  { %1973 = dma.done.wait [#allocation9], 64  }
  0x4c   :  { %1974 = vsyncadd [#allocation9], 4294967232  ;;  %v90_v1 = vld [vmem:[#allocation5 + $0x8] sm:$0xff]  ;;  %v92_v3 = vld [vmem:[#allocation5 + $0x18] sm:$0xff]  ;;  %vm1308_vm0 = vcmask 7168  }
  0x4d   :  { %v94_v2 = vld [vmem:[#allocation5 + $0x28] sm:$0xff]  ;;  %v96_v5 = vld [vmem:[#allocation5 + $0x38] sm:$0xff]  ;;  %v89_v6 = vld [vmem:[#allocation5] sm:$0xff] }
  0x4e   :  { %v1321_v4 = vpack.c.bf16 %v94_v2, %v90_v1  ;;  %v93_v7 = vld [vmem:[#allocation5 + $0x20] sm:$0xff]  ;;  %v1577_v8 = vpack.c.bf16 %v96_v5, %v92_v3  ;;  %v91_v10 = vld [vmem:[#allocation5 + $0x10] sm:$0xff]  ;;  %v98_v12 = vld [vmem:[#allocation5 + $0x48] sm:$0xff] }
  0x4f   :  { %v1323_v9 = vpack.c.bf16 %v93_v7, %v89_v6  ;;  %v95_v11 = vld [vmem:[#allocation5 + $0x30] sm:$0xff]  ;;  %v102_v14 = vld [vmem:[#allocation5 + $0x68] sm:$0xff]  ;;  %v100_v15 = vld [vmem:[#allocation5 + $0x58] sm:$0xff] }
  0x50   :  { %1322 = vmatprep.subr.bf16.mxu0 %v1321_v4  ;;  %v1579_v13 = vpack.c.bf16 %v95_v11, %v91_v10  ;;  %v104_v16 = vld [vmem:[#allocation5 + $0x78] sm:$0xff]  ;;  %1578 = vmatprep.subr.bf16.mxu1 %v1577_v8  ;;  %v1325_v17 = vpack.c.bf16 %v102_v14, %v98_v12  ;;  %v97_v19 = vld [vmem:[#allocation5 + $0x40] sm:$0xff]  ;;  %v99_v21 = vld [vmem:[#allocation5 + $0x50] sm:$0xff] }
  0x51   :  { %1324 = vmatpush1.bf16.msra.mxu0 %v1323_v9  ;;  %v1581_v18 = vpack.c.bf16 %v104_v16, %v100_v15  ;;  %v101_v20 = vld [vmem:[#allocation5 + $0x60] sm:$0xff]  ;;  %v103_v23 = vld [vmem:[#allocation5 + $0x70] sm:$0xff]  ;;  %v106_v24 = vld [vmem:[#allocation5 + $0x88] sm:$0xff] }
  0x52   :  { %1580 = vmatpush1.bf16.msra.mxu1 %v1579_v13  ;;  %v1327_v22 = vpack.c.bf16 %v101_v20, %v97_v19  ;;  %v110_v25 = vld [vmem:[#allocation5 + $0xa8] sm:$0xff]  ;;  %1326 = vmatprep.subr.bf16.mxu0 %v1325_v17  ;;  %v1583_v26 = vpack.c.bf16 %v103_v23, %v99_v21  ;;  %v108_v28 = vld [vmem:[#allocation5 + $0x98] sm:$0xff]  ;;  %v105_v30 = vld [vmem:[#allocation5 + $0x80] sm:$0xff] }
  0x53   :  { %1582 = vmatprep.subr.bf16.mxu1 %v1581_v18  ;;  %v1329_v27 = vpack.c.bf16 %v110_v25, %v106_v24  ;;  %v112_v29 = vld [vmem:[#allocation5 + $0xb8] sm:$0xff]  ;;  %v109_v32 = vld [vmem:[#allocation5 + $0xa0] sm:$0xff]  ;;  %v107_v33 = vld [vmem:[#allocation5 + $0x90] sm:$0xff] }
  0x54   :  { %v1585_v31 = vpack.c.bf16 %v112_v29, %v108_v28  ;;  %v111_v34 = vld [vmem:[#allocation5 + $0xb0] sm:$0xff]  ;;  %v1331_v35 = vpack.c.bf16 %v109_v32, %v105_v30  ;;  %v114_v36 = vld [vmem:[#allocation5 + $0xc8] sm:$0xff]  ;;  %v116_v38 = vld [vmem:[#allocation5 + $0xd8] sm:$0xff] }
  0x55   :  { %1328 = vmatpush1.bf16.msra.mxu0 %v1327_v22  ;;  %v118_v37 = vld [vmem:[#allocation5 + $0xe8] sm:$0xff]  ;;  %v1587_v39 = vpack.c.bf16 %v111_v34, %v107_v33  ;;  %v120_v41 = vld [vmem:[#allocation5 + $0xf8] sm:$0xff]  ;;  %v113_v42 = vld [vmem:[#allocation5 + $0xc0] sm:$0xff] }
  0x56   :  { %1584 = vmatpush1.bf16.msra.mxu1 %v1583_v26  ;;  %1330 = vmatprep.subr.bf16.mxu0 %v1329_v27  ;;  %v1333_v40 = vpack.c.bf16 %v118_v37, %v114_v36  ;;  %v117_v43 = vld [vmem:[#allocation5 + $0xe0] sm:$0xff]  ;;  %v1589_v44 = vpack.c.bf16 %v120_v41, %v116_v38  ;;  %v115_v45 = vld [vmem:[#allocation5 + $0xd0] sm:$0xff]  ;;  %v122_v47 = vld [vmem:[#allocation5 + $0x108] sm:$0xff] }
  0x57   :  { %1586 = vmatprep.subr.bf16.mxu1 %v1585_v31  ;;  %v119_v46 = vld [vmem:[#allocation5 + $0xf0] sm:$0xff]  ;;  %v126_v48 = vld [vmem:[#allocation5 + $0x128] sm:$0xff]  ;;  %v124_v49 = vld [vmem:[#allocation5 + $0x118] sm:$0xff]  ;;  %v1335_v51 = vpack.c.bf16 %v117_v43, %v113_v42 }
  0x58   :  { %v128_v50 = vld [vmem:[#allocation5 + $0x138] sm:$0xff]  ;;  %v1591_v52 = vpack.c.bf16 %v119_v46, %v115_v45  ;;  %v1337_v53 = vpack.c.bf16 %v126_v48, %v122_v47  ;;  %v121_v54 = vld [vmem:[#allocation5 + $0x100] sm:$0xff]  ;;  %v123_v56 = vld [vmem:[#allocation5 + $0x110] sm:$0xff] }
  0x59   :  { %1332 = vmatpush1.bf16.msra.mxu0 %v1331_v35  ;;  %v125_v55 = vld [vmem:[#allocation5 + $0x120] sm:$0xff]  ;;  %v1593_v57 = vpack.c.bf16 %v128_v50, %v124_v49  ;;  %v127_v58 = vld [vmem:[#allocation5 + $0x130] sm:$0xff]  ;;  %v130_v59 = vld [vmem:[#allocation5 + $0x148] sm:$0xff] }
  0x5a   :  { %1588 = vmatpush1.bf16.msra.mxu1 %v1587_v39  ;;  %1334 = vmatprep.subr.bf16.mxu0 %v1333_v40  ;;  %v134_v60 = vld [vmem:[#allocation5 + $0x168] sm:$0xff]  ;;  %v132_v61 = vld [vmem:[#allocation5 + $0x158] sm:$0xff]  ;;  %v1339_v63 = vpack.c.bf16 %v125_v55, %v121_v54  ;;  %v1595_v0 = vpack.c.bf16 %v127_v58, %v123_v56  ;;  %v129_v2 = vld [vmem:[#allocation5 + $0x140] sm:$0xff] }
  0x5b   :  { %1590 = vmatprep.subr.bf16.mxu1 %v1589_v44  ;;  %v136_v62 = vld [vmem:[#allocation5 + $0x178] sm:$0xff]  ;;  %v1341_v1 = vpack.c.bf16 %v134_v60, %v130_v59  ;;  %v133_v3 = vld [vmem:[#allocation5 + $0x160] sm:$0xff]  ;;  %v131_v4 = vld [vmem:[#allocation5 + $0x150] sm:$0xff] }
  0x5c   :  { %v1597_v5 = vpack.c.bf16 %v136_v62, %v132_v61  ;;  %v135_v6 = vld [vmem:[#allocation5 + $0x170] sm:$0xff]  ;;  %v138_v7 = vld [vmem:[#allocation5 + $0x188] sm:$0xff]  ;;  %v140_v9 = vld [vmem:[#allocation5 + $0x198] sm:$0xff]  ;;  %v1343_v11 = vpack.c.bf16 %v133_v3, %v129_v2 }
  0x5d   :  { %1336 = vmatpush1.bf16.msra.mxu0 %v1335_v51  ;;  %v142_v8 = vld [vmem:[#allocation5 + $0x1a8] sm:$0xff]  ;;  %v144_v10 = vld [vmem:[#allocation5 + $0x1b8] sm:$0xff]  ;;  %v1599_v12 = vpack.c.bf16 %v135_v6, %v131_v4  ;;  %v137_v14 = vld [vmem:[#allocation5 + $0x180] sm:$0xff] }
  0x5e   :  { %1592 = vmatpush1.bf16.msra.mxu1 %v1591_v52  ;;  %1338 = vmatprep.subr.bf16.mxu0 %v1337_v53  ;;  %v1345_v13 = vpack.c.bf16 %v142_v8, %v138_v7  ;;  %v141_v15 = vld [vmem:[#allocation5 + $0x1a0] sm:$0xff]  ;;  %v139_v16 = vld [vmem:[#allocation5 + $0x190] sm:$0xff]  ;;  %v1601_v17 = vpack.c.bf16 %v144_v10, %v140_v9  ;;  %v146_v19 = vld [vmem:[#allocation5 + $0x1c8] sm:$0xff] }
  0x5f   :  { %1594 = vmatprep.subr.bf16.mxu1 %v1593_v57  ;;  %v143_v18 = vld [vmem:[#allocation5 + $0x1b0] sm:$0xff]  ;;  %v150_v20 = vld [vmem:[#allocation5 + $0x1e8] sm:$0xff]  ;;  %v148_v21 = vld [vmem:[#allocation5 + $0x1d8] sm:$0xff]  ;;  %v1347_v23 = vpack.c.bf16 %v141_v15, %v137_v14 }
  0x60   :  { %v152_v22 = vld [vmem:[#allocation5 + $0x1f8] sm:$0xff]  ;;  %v1603_v24 = vpack.c.bf16 %v143_v18, %v139_v16  ;;  %v1349_v25 = vpack.c.bf16 %v150_v20, %v146_v19  ;;  %v145_v26 = vld [vmem:[#allocation5 + $0x1c0] sm:$0xff]  ;;  %v147_v28 = vld [vmem:[#allocation5 + $0x1d0] sm:$0xff] }
  0x61   :  { %1340 = vmatpush1.bf16.msra.mxu0 %v1339_v63  ;;  %v149_v27 = vld [vmem:[#allocation5 + $0x1e0] sm:$0xff]  ;;  %v1605_v29 = vpack.c.bf16 %v152_v22, %v148_v21  ;;  %v151_v30 = vld [vmem:[#allocation5 + $0x1f0] sm:$0xff]  ;;  %v154_v31 = vld [vmem:[#allocation5 + $0x208] sm:$0xff] }
  0x62   :  { %1596 = vmatpush1.bf16.msra.mxu1 %v1595_v0  ;;  %1342 = vmatprep.subr.bf16.mxu0 %v1341_v1  ;;  %v158_v32 = vld [vmem:[#allocation5 + $0x228] sm:$0xff]  ;;  %v156_v33 = vld [vmem:[#allocation5 + $0x218] sm:$0xff]  ;;  %v1351_v35 = vpack.c.bf16 %v149_v27, %v145_v26  ;;  %v1607_v36 = vpack.c.bf16 %v151_v30, %v147_v28  ;;  %v153_v38 = vld [vmem:[#allocation5 + $0x200] sm:$0xff] }
  0x63   :  { %1598 = vmatprep.subr.bf16.mxu1 %v1597_v5  ;;  %v160_v34 = vld [vmem:[#allocation5 + $0x238] sm:$0xff]  ;;  %v1353_v37 = vpack.c.bf16 %v158_v32, %v154_v31  ;;  %v157_v39 = vld [vmem:[#allocation5 + $0x220] sm:$0xff]  ;;  %v155_v40 = vld [vmem:[#allocation5 + $0x210] sm:$0xff] }
  0x64   :  { %v1609_v41 = vpack.c.bf16 %v160_v34, %v156_v33  ;;  %v159_v42 = vld [vmem:[#allocation5 + $0x230] sm:$0xff]  ;;  %v162_v43 = vld [vmem:[#allocation5 + $0x248] sm:$0xff]  ;;  %v164_v45 = vld [vmem:[#allocation5 + $0x258] sm:$0xff]  ;;  %v1355_v47 = vpack.c.bf16 %v157_v39, %v153_v38 }
  0x65   :  { %1344 = vmatpush1.bf16.msra.mxu0 %v1343_v11  ;;  %v166_v44 = vld [vmem:[#allocation5 + $0x268] sm:$0xff]  ;;  %v168_v46 = vld [vmem:[#allocation5 + $0x278] sm:$0xff]  ;;  %v1611_v48 = vpack.c.bf16 %v159_v42, %v155_v40  ;;  %v161_v50 = vld [vmem:[#allocation5 + $0x240] sm:$0xff] }
  0x66   :  { %1600 = vmatpush1.bf16.msra.mxu1 %v1599_v12  ;;  %1346 = vmatprep.subr.bf16.mxu0 %v1345_v13  ;;  %v1357_v49 = vpack.c.bf16 %v166_v44, %v162_v43  ;;  %v165_v51 = vld [vmem:[#allocation5 + $0x260] sm:$0xff]  ;;  %v163_v52 = vld [vmem:[#allocation5 + $0x250] sm:$0xff]  ;;  %v1613_v53 = vpack.c.bf16 %v168_v46, %v164_v45  ;;  %v170_v55 = vld [vmem:[#allocation5 + $0x288] sm:$0xff] }
  0x67   :  { %1602 = vmatprep.subr.bf16.mxu1 %v1601_v17  ;;  %v167_v54 = vld [vmem:[#allocation5 + $0x270] sm:$0xff]  ;;  %v174_v56 = vld [vmem:[#allocation5 + $0x2a8] sm:$0xff]  ;;  %v172_v57 = vld [vmem:[#allocation5 + $0x298] sm:$0xff]  ;;  %v1359_v59 = vpack.c.bf16 %v165_v51, %v161_v50 }
  0x68   :  { %v176_v58 = vld [vmem:[#allocation5 + $0x2b8] sm:$0xff]  ;;  %v1615_v60 = vpack.c.bf16 %v167_v54, %v163_v52  ;;  %v1361_v61 = vpack.c.bf16 %v174_v56, %v170_v55  ;;  %v169_v62 = vld [vmem:[#allocation5 + $0x280] sm:$0xff]  ;;  %v171_v0 = vld [vmem:[#allocation5 + $0x290] sm:$0xff] }
  0x69   :  { %1348 = vmatpush1.bf16.msra.mxu0 %v1347_v23  ;;  %v173_v63 = vld [vmem:[#allocation5 + $0x2a0] sm:$0xff]  ;;  %v1617_v1 = vpack.c.bf16 %v176_v58, %v172_v57  ;;  %v175_v2 = vld [vmem:[#allocation5 + $0x2b0] sm:$0xff]  ;;  %v178_v3 = vld [vmem:[#allocation5 + $0x2c8] sm:$0xff] }
  0x6a   :  { %1604 = vmatpush1.bf16.msra.mxu1 %v1603_v24  ;;  %1350 = vmatprep.subr.bf16.mxu0 %v1349_v25  ;;  %v182_v4 = vld [vmem:[#allocation5 + $0x2e8] sm:$0xff]  ;;  %v180_v5 = vld [vmem:[#allocation5 + $0x2d8] sm:$0xff]  ;;  %v1363_v7 = vpack.c.bf16 %v173_v63, %v169_v62  ;;  %v177_v8 = vld [vmem:[#allocation5 + $0x2c0] sm:$0xff]  ;;  %v1619_v9 = vpack.c.bf16 %v175_v2, %v171_v0 }
  0x6b   :  { %1606 = vmatprep.subr.bf16.mxu1 %v1605_v29  ;;  %v184_v6 = vld [vmem:[#allocation5 + $0x2f8] sm:$0xff]  ;;  %v1365_v10 = vpack.c.bf16 %v182_v4, %v178_v3  ;;  %v181_v11 = vld [vmem:[#allocation5 + $0x2e0] sm:$0xff]  ;;  %v179_v12 = vld [vmem:[#allocation5 + $0x2d0] sm:$0xff] }
  0x6c   :  { %v183_v13 = vld [vmem:[#allocation5 + $0x2f0] sm:$0xff]  ;;  %v1621_v14 = vpack.c.bf16 %v184_v6, %v180_v5  ;;  %v186_v15 = vld [vmem:[#allocation5 + $0x308] sm:$0xff]  ;;  %v188_v18 = vld [vmem:[#allocation5 + $0x318] sm:$0xff]  ;;  %v1367_v20 = vpack.c.bf16 %v181_v11, %v177_v8 }
  0x6d   :  { %1352 = vmatpush1.bf16.msra.mxu0 %v1351_v35  ;;  %v190_v16 = vld [vmem:[#allocation5 + $0x328] sm:$0xff]  ;;  %v192_v19 = vld [vmem:[#allocation5 + $0x338] sm:$0xff]  ;;  %v1623_v21 = vpack.c.bf16 %v183_v13, %v179_v12  ;;  %v185_v23 = vld [vmem:[#allocation5 + $0x300] sm:$0xff] }
  0x6e   :  { %1608 = vmatpush1.bf16.msra.mxu1 %v1607_v36  ;;  %1354 = vmatprep.subr.bf16.mxu0 %v1353_v37  ;;  %v74_v17 = vld [vmem:[#allocation3 + $0x8] sm:$0xff]  ;;  %v1369_v22 = vpack.c.bf16 %v190_v16, %v186_v15  ;;  %v189_v24 = vld [vmem:[#allocation5 + $0x320] sm:$0xff]  ;;  %v187_v25 = vld [vmem:[#allocation5 + $0x310] sm:$0xff]  ;;  %v1625_v26 = vpack.c.bf16 %v192_v19, %v188_v18 }
  0x6f   :  { %1610 = vmatprep.subr.bf16.mxu1 %v1609_v41  ;;  %687 = vmatprep.mubr.f32.mxu0 %v74_v17  ;;  %v191_v27 = vld [vmem:[#allocation5 + $0x330] sm:$0xff]  ;;  %v194_v28 = vld [vmem:[#allocation5 + $0x348] sm:$0xff]  ;;  %v196_v30 = vld [vmem:[#allocation5 + $0x358] sm:$0xff]  ;;  %v1371_v32 = vpack.c.bf16 %v189_v24, %v185_v23 }
  0x70   :  { %995 = vmatprep.mubr.f32.mxu1 %v74_v17  ;;  %v198_v29 = vld [vmem:[#allocation5 + $0x368] sm:$0xff]  ;;  %v200_v31 = vld [vmem:[#allocation5 + $0x378] sm:$0xff]  ;;  %v1627_v33 = vpack.c.bf16 %v191_v27, %v187_v25  ;;  %v193_v35 = vld [vmem:[#allocation5 + $0x340] sm:$0xff] }
  0x71   :  { %1356 = vmatpush1.bf16.msra.mxu0 %v1355_v47  ;;  %v1373_v34 = vpack.c.bf16 %v198_v29, %v194_v28  ;;  %v197_v36 = vld [vmem:[#allocation5 + $0x360] sm:$0xff]  ;;  %v195_v37 = vld [vmem:[#allocation5 + $0x350] sm:$0xff]  ;;  %v1629_v38 = vpack.c.bf16 %v200_v31, %v196_v30  ;;  %v202_v40 = vld [vmem:[#allocation5 + $0x388] sm:$0xff] }
  0x72   :  { %1612 = vmatpush1.bf16.msra.mxu1 %v1611_v48  ;;  %1358 = vmatprep.subr.bf16.mxu0 %v1357_v49  ;;  %v199_v39 = vld [vmem:[#allocation5 + $0x370] sm:$0xff]  ;;  %v206_v41 = vld [vmem:[#allocation5 + $0x3a8] sm:$0xff]  ;;  %v204_v42 = vld [vmem:[#allocation5 + $0x398] sm:$0xff]  ;;  %v1375_v44 = vpack.c.bf16 %v197_v36, %v193_v35 }
  0x73   :  { %1614 = vmatprep.subr.bf16.mxu1 %v1613_v53  ;;  %v208_v43 = vld [vmem:[#allocation5 + $0x3b8] sm:$0xff]  ;;  %v1631_v45 = vpack.c.bf16 %v199_v39, %v195_v37  ;;  %v1377_v46 = vpack.c.bf16 %v206_v41, %v202_v40  ;;  %v201_v47 = vld [vmem:[#allocation5 + $0x380] sm:$0xff]  ;;  %v203_v49 = vld [vmem:[#allocation5 + $0x390] sm:$0xff] }
  0x74   :  { %v205_v48 = vld [vmem:[#allocation5 + $0x3a0] sm:$0xff]  ;;  %v1633_v50 = vpack.c.bf16 %v208_v43, %v204_v42  ;;  %v207_v51 = vld [vmem:[#allocation5 + $0x3b0] sm:$0xff]  ;;  %v210_v52 = vld [vmem:[#allocation5 + $0x3c8] sm:$0xff] }
  0x75   :  { %1360 = vmatpush1.bf16.msra.mxu0 %v1359_v59  ;;  %v214_v53 = vld [vmem:[#allocation5 + $0x3e8] sm:$0xff]  ;;  %v212_v54 = vld [vmem:[#allocation5 + $0x3d8] sm:$0xff]  ;;  %v1379_v56 = vpack.c.bf16 %v205_v48, %v201_v47  ;;  %v1635_v57 = vpack.c.bf16 %v207_v51, %v203_v49  ;;  %v209_v59 = vld [vmem:[#allocation5 + $0x3c0] sm:$0xff] }
  0x76   :  { %1616 = vmatpush1.bf16.msra.mxu1 %v1615_v60  ;;  %1362 = vmatprep.subr.bf16.mxu0 %v1361_v61  ;;  %v216_v55 = vld [vmem:[#allocation5 + $0x3f8] sm:$0xff]  ;;  %v1381_v58 = vpack.c.bf16 %v214_v53, %v210_v52  ;;  %v213_v60 = vld [vmem:[#allocation5 + $0x3e0] sm:$0xff]  ;;  %v211_v61 = vld [vmem:[#allocation5 + $0x3d0] sm:$0xff] }
  0x77   :  { %1618 = vmatprep.subr.bf16.mxu1 %v1617_v1  ;;  %v1637_v62 = vpack.c.bf16 %v216_v55, %v212_v54  ;;  %v215_v63 = vld [vmem:[#allocation5 + $0x3f0] sm:$0xff]  ;;  %v218_v0 = vld [vmem:[#allocation5 + $0x408] sm:$0xff]  ;;  %v220_v2 = vld [vmem:[#allocation5 + $0x418] sm:$0xff]  ;;  %v1383_v4 = vpack.c.bf16 %v213_v60, %v209_v59 }
  0x78   :  { %v222_v1 = vld [vmem:[#allocation5 + $0x428] sm:$0xff]  ;;  %v224_v3 = vld [vmem:[#allocation5 + $0x438] sm:$0xff]  ;;  %v1639_v5 = vpack.c.bf16 %v215_v63, %v211_v61  ;;  %v221_v8 = vld [vmem:[#allocation5 + $0x420] sm:$0xff] }
  0x79   :  { %1364 = vmatpush1.bf16.msra.mxu0 %v1363_v7  ;;  %v1385_v6 = vpack.c.bf16 %v222_v1, %v218_v0  ;;  %v217_v7 = vld [vmem:[#allocation5 + $0x400] sm:$0xff]  ;;  %v223_v11 = vld [vmem:[#allocation5 + $0x430] sm:$0xff]  ;;  %v226_v12 = vld [vmem:[#allocation5 + $0x448] sm:$0xff] }
  0x7a   :  { %1620 = vmatpush1.bf16.msra.mxu1 %v1619_v9  ;;  %1366 = vmatprep.subr.bf16.mxu0 %v1365_v10  ;;  %v219_v9 = vld [vmem:[#allocation5 + $0x410] sm:$0xff]  ;;  %v1641_v10 = vpack.c.bf16 %v224_v3, %v220_v2  ;;  %v230_v13 = vld [vmem:[#allocation5 + $0x468] sm:$0xff]  ;;  %v232_v15 = vld [vmem:[#allocation5 + $0x478] sm:$0xff]  ;;  %v1387_v17 = vpack.c.bf16 %v221_v8, %v217_v7 }
  0x7b   :  { %1622 = vmatprep.subr.bf16.mxu1 %v1621_v14  ;;  %v228_v14 = vld [vmem:[#allocation5 + $0x458] sm:$0xff]  ;;  %v73_v16 = vld [vmem:[#allocation3] sm:$0xff]  ;;  %v1643_v18 = vpack.c.bf16 %v223_v11, %v219_v9  ;;  %v1389_v19 = vpack.c.bf16 %v230_v13, %v226_v12  ;;  %v231_v24 = vld [vmem:[#allocation5 + $0x470] sm:$0xff] }
  0x7c   :  { %v1645_v23 = vpack.c.bf16 %v232_v15, %v228_v14  ;;  %v234_v25 = vld [vmem:[#allocation5 + $0x488] sm:$0xff]  ;;  %v236_v27 = vld [vmem:[#allocation5 + $0x498] sm:$0xff]  ;;  %v239_v36 = vld [vmem:[#allocation5 + $0x4b0] sm:$0xff] }
  0x7d   :  { %1368 = vmatpush1.bf16.msra.mxu0 %v1367_v20  ;;  %v225_v20 = vld [vmem:[#allocation5 + $0x440] sm:$0xff]  ;;  %v240_v28 = vld [vmem:[#allocation5 + $0x4b8] sm:$0xff]  ;;  %v242_v37 = vld [vmem:[#allocation5 + $0x4c8] sm:$0xff] }
  0x7e   :  { %1624 = vmatpush1.bf16.msra.mxu1 %v1623_v21  ;;  %1370 = vmatprep.subr.bf16.mxu0 %v1369_v22  ;;  %v229_v21 = vld [vmem:[#allocation5 + $0x460] sm:$0xff]  ;;  %v227_v22 = vld [vmem:[#allocation5 + $0x450] sm:$0xff]  ;;  %v1649_v35 = vpack.c.bf16 %v240_v28, %v236_v27  ;;  %v244_v39 = vld [vmem:[#allocation5 + $0x4d8] sm:$0xff] }
  0x7f   :  { %1626 = vmatprep.subr.bf16.mxu1 %v1625_v26  ;;  %v238_v26 = vld [vmem:[#allocation5 + $0x4a8] sm:$0xff]  ;;  %v1391_v29 = vpack.c.bf16 %v229_v21, %v225_v20  ;;  %v1647_v30 = vpack.c.bf16 %v231_v24, %v227_v22  ;;  %v248_v40 = vld [vmem:[#allocation5 + $0x4f8] sm:$0xff]  ;;  %v247_v48 = vld [vmem:[#allocation5 + $0x4f0] sm:$0xff] }
  0x80   :  { %v1393_v31 = vpack.c.bf16 %v238_v26, %v234_v25  ;;  %v1653_v47 = vpack.c.bf16 %v248_v40, %v244_v39  ;;  %v250_v49 = vld [vmem:[#allocation5 + $0x508] sm:$0xff]  ;;  %v252_v51 = vld [vmem:[#allocation5 + $0x518] sm:$0xff]  ;;  %v255_v60 = vld [vmem:[#allocation5 + $0x530] sm:$0xff] }
  0x81   :  { %1372 = vmatpush1.bf16.msra.mxu0 %v1371_v32  ;;  %v233_v32 = vld [vmem:[#allocation5 + $0x480] sm:$0xff]  ;;  %v256_v52 = vld [vmem:[#allocation5 + $0x538] sm:$0xff]  ;;  %v258_v61 = vld [vmem:[#allocation5 + $0x548] sm:$0xff] }
  0x82   :  { %1628 = vmatpush1.bf16.msra.mxu1 %v1627_v33  ;;  %1374 = vmatprep.subr.bf16.mxu0 %v1373_v34  ;;  %v237_v33 = vld [vmem:[#allocation5 + $0x4a0] sm:$0xff]  ;;  %v235_v34 = vld [vmem:[#allocation5 + $0x490] sm:$0xff]  ;;  %v1657_v59 = vpack.c.bf16 %v256_v52, %v252_v51  ;;  %v260_v63 = vld [vmem:[#allocation5 + $0x558] sm:$0xff] }
  0x83   :  { %1630 = vmatprep.subr.bf16.mxu1 %v1629_v38  ;;  %v246_v38 = vld [vmem:[#allocation5 + $0x4e8] sm:$0xff]  ;;  %v1395_v41 = vpack.c.bf16 %v237_v33, %v233_v32  ;;  %v1651_v42 = vpack.c.bf16 %v239_v36, %v235_v34  ;;  %v264_v0 = vld [vmem:[#allocation5 + $0x578] sm:$0xff]  ;;  %v263_v8 = vld [vmem:[#allocation5 + $0x570] sm:$0xff] }
  0x84   :  { %v1397_v43 = vpack.c.bf16 %v246_v38, %v242_v37  ;;  %v1661_v7 = vpack.c.bf16 %v264_v0, %v260_v63  ;;  %v266_v9 = vld [vmem:[#allocation5 + $0x588] sm:$0xff]  ;;  %v268_v11 = vld [vmem:[#allocation5 + $0x598] sm:$0xff]  ;;  %v265_v15 = vld [vmem:[#allocation5 + $0x580] sm:$0xff] }
  0x85   :  { %1376 = vmatpush1.bf16.msra.mxu0 %v1375_v44  ;;  %v241_v44 = vld [vmem:[#allocation5 + $0x4c0] sm:$0xff]  ;;  %v272_v12 = vld [vmem:[#allocation5 + $0x5b8] sm:$0xff]  ;;  %v82_v13 = vld [vmem:[#allocation3 + $0x48] sm:$0xff] }
  0x86   :  { %1632 = vmatpush1.bf16.msra.mxu1 %v1631_v45  ;;  %1378 = vmatprep.subr.bf16.mxu0 %v1377_v46  ;;  %v245_v45 = vld [vmem:[#allocation5 + $0x4e0] sm:$0xff]  ;;  %v243_v46 = vld [vmem:[#allocation5 + $0x4d0] sm:$0xff]  ;;  %v1665_v22 = vpack.c.bf16 %v272_v12, %v268_v11  ;;  %v278_v24 = vld [vmem:[#allocation5 + $0x5e8] sm:$0xff] }
  0x87   :  { %1634 = vmatprep.subr.bf16.mxu1 %v1633_v50  ;;  %v254_v50 = vld [vmem:[#allocation5 + $0x528] sm:$0xff]  ;;  %v1399_v53 = vpack.c.bf16 %v245_v45, %v241_v44  ;;  %v1655_v54 = vpack.c.bf16 %v247_v48, %v243_v46  ;;  %v271_v20 = vld [vmem:[#allocation5 + $0x5b0] sm:$0xff]  ;;  %v81_v21 = vld [vmem:[#allocation3 + $0x40] sm:$0xff] }
  0x88   :  { %v1401_v55 = vpack.c.bf16 %v254_v50, %v250_v49  ;;  %v76_v25 = vld [vmem:[#allocation3 + $0x18] sm:$0xff]  ;;  %v277_v32 = vld [vmem:[#allocation5 + $0x5e0] sm:$0xff]  ;;  %v275_v33 = vld [vmem:[#allocation5 + $0x5d0] sm:$0xff] }
  0x89   :  { %1380 = vmatpush1.bf16.msra.mxu0 %v1379_v56  ;;  %v249_v56 = vld [vmem:[#allocation5 + $0x500] sm:$0xff]  ;;  %v276_v26 = vld [vmem:[#allocation5 + $0x5d8] sm:$0xff]  ;;  %v282_v36 = vld [vmem:[#allocation5 + $0x608] sm:$0xff] }
  0x8a   :  { %1636 = vmatpush1.bf16.msra.mxu1 %v1635_v57  ;;  %1382 = vmatprep.subr.bf16.mxu0 %v1381_v58  ;;  %v253_v57 = vld [vmem:[#allocation5 + $0x520] sm:$0xff]  ;;  %v251_v58 = vld [vmem:[#allocation5 + $0x510] sm:$0xff]  ;;  %v280_v27 = vld [vmem:[#allocation5 + $0x5f8] sm:$0xff] }
  0x8b   :  { %1638 = vmatprep.subr.bf16.mxu1 %v1637_v62  ;;  %v262_v62 = vld [vmem:[#allocation5 + $0x568] sm:$0xff]  ;;  %v1403_v1 = vpack.c.bf16 %v253_v57, %v249_v56  ;;  %v1659_v2 = vpack.c.bf16 %v255_v60, %v251_v58  ;;  %v1669_v34 = vpack.c.bf16 %v280_v27, %v276_v26  ;;  %v284_v38 = vld [vmem:[#allocation5 + $0x618] sm:$0xff]  ;;  %v285_v44 = vld [vmem:[#allocation5 + $0x620] sm:$0xff] }
  0x8c   :  { %v1405_v3 = vpack.c.bf16 %v262_v62, %v258_v61  ;;  %v286_v37 = vld [vmem:[#allocation5 + $0x628] sm:$0xff]  ;;  %v288_v39 = vld [vmem:[#allocation5 + $0x638] sm:$0xff]  ;;  %v283_v45 = vld [vmem:[#allocation5 + $0x610] sm:$0xff] }
  0x8d   :  { %1384 = vmatpush1.bf16.msra.mxu0 %v1383_v4  ;;  %v257_v4 = vld [vmem:[#allocation5 + $0x540] sm:$0xff]  ;;  %v1673_v46 = vpack.c.bf16 %v288_v39, %v284_v38  ;;  %v290_v48 = vld [vmem:[#allocation5 + $0x648] sm:$0xff]  ;;  %v292_v50 = vld [vmem:[#allocation5 + $0x658] sm:$0xff] }
  0x8e   :  { %1640 = vmatpush1.bf16.msra.mxu1 %v1639_v5  ;;  %1386 = vmatprep.subr.bf16.mxu0 %v1385_v6  ;;  %v261_v5 = vld [vmem:[#allocation5 + $0x560] sm:$0xff]  ;;  %v259_v6 = vld [vmem:[#allocation5 + $0x550] sm:$0xff]  ;;  %v294_v49 = vld [vmem:[#allocation5 + $0x668] sm:$0xff] }
  0x8f   :  { %1642 = vmatprep.subr.bf16.mxu1 %v1641_v10  ;;  %v270_v10 = vld [vmem:[#allocation5 + $0x5a8] sm:$0xff]  ;;  %v1407_v14 = vpack.c.bf16 %v261_v5, %v257_v4  ;;  %v296_v51 = vld [vmem:[#allocation5 + $0x678] sm:$0xff]  ;;  %v293_v56 = vld [vmem:[#allocation5 + $0x660] sm:$0xff] }
  0x90   :  { %688 = vmatmul.mubr.f32.vlgmr.msra.gmra.mrb[0].mxu0 %v73_v16  ;;  %v291_v57 = vld [vmem:[#allocation5 + $0x650] sm:$0xff]  ;;  %v1677_v58 = vpack.c.bf16 %v296_v51, %v292_v50  ;;  %v298_v60 = vld [vmem:[#allocation5 + $0x688] sm:$0xff]  ;;  %v300_v62 = vld [vmem:[#allocation5 + $0x698] sm:$0xff] }
  0x91   :  { %1388 = vmatpush1.bf16.msra.mxu0 %v1387_v17  ;;  %996 = vmatmul.mubr.f32.vlgmr.msra.gmra.mrb[0].mxu1 %v73_v16  ;;  %v269_v16 = vld [vmem:[#allocation5 + $0x5a0] sm:$0xff]  ;;  %v1663_v17 = vpack.c.bf16 %v263_v8, %v259_v6  ;;  %v302_v61 = vld [vmem:[#allocation5 + $0x6a8] sm:$0xff]  ;;  %v304_v63 = vld [vmem:[#allocation5 + $0x6b8] sm:$0xff] }
  0x92   :  { %1644 = vmatpush1.bf16.msra.mxu1 %v1643_v18  ;;  %1390 = vmatprep.subr.bf16.mxu0 %v1389_v19  ;;  %v1409_v18 = vpack.c.bf16 %v270_v10, %v266_v9  ;;  %v267_v19 = vld [vmem:[#allocation5 + $0x590] sm:$0xff]  ;;  %v1411_v28 = vpack.c.bf16 %v269_v16, %v265_v15  ;;  %v301_v4 = vld [vmem:[#allocation5 + $0x6a0] sm:$0xff]  ;;  %v1681_v6 = vpack.c.bf16 %v304_v63, %v300_v62  ;;  %v306_v8 = vld [vmem:[#allocation5 + $0x6c8] sm:$0xff] }
  0x93   :  { %1646 = vmatprep.subr.bf16.mxu1 %v1645_v23  ;;  %693 = vmatprep.mubr.f32.mxu0 %v82_v13  ;;  %v274_v23 = vld [vmem:[#allocation5 + $0x5c8] sm:$0xff]  ;;  %v299_v5 = vld [vmem:[#allocation5 + $0x690] sm:$0xff]  ;;  %v308_v10 = vld [vmem:[#allocation5 + $0x6d8] sm:$0xff] }
  0x94   :  { %1001 = vmatprep.mubr.f32.mxu1 %v82_v13  ;;  %694 = vmatmul.mubr.f32.gmra.mrb[2].mxu0 %v81_v21  ;;  %v310_v9 = vld [vmem:[#allocation5 + $0x6e8] sm:$0xff]  ;;  %v312_v11 = vld [vmem:[#allocation5 + $0x6f8] sm:$0xff]  ;;  %v305_v15 = vld [vmem:[#allocation5 + $0x6c0] sm:$0xff] }
  0x95   :  { %1392 = vmatpush1.bf16.msra.mxu0 %v1391_v29  ;;  %1002 = vmatmul.mubr.f32.gmra.mrb[2].mxu1 %v81_v21  ;;  %v1667_v29 = vpack.c.bf16 %v271_v20, %v267_v19  ;;  %v309_v16 = vld [vmem:[#allocation5 + $0x6e0] sm:$0xff]  ;;  %v311_v19 = vld [vmem:[#allocation5 + $0x6f0] sm:$0xff]  ;;  %v314_v20 = vld [vmem:[#allocation5 + $0x708] sm:$0xff] }
  0x96   :  { %1648 = vmatpush1.bf16.msra.mxu1 %v1647_v30  ;;  %1394 = vmatprep.subr.bf16.mxu0 %v1393_v31  ;;  %v1413_v30 = vpack.c.bf16 %v278_v24, %v274_v23  ;;  %v273_v31 = vld [vmem:[#allocation5 + $0x5c0] sm:$0xff]  ;;  %v318_v21 = vld [vmem:[#allocation5 + $0x728] sm:$0xff]  ;;  %v320_v23 = vld [vmem:[#allocation5 + $0x738] sm:$0xff]  ;;  %v1431_v24 = vpack.c.bf16 %v309_v16, %v305_v15 }
  0x97   :  { %1650 = vmatprep.subr.bf16.mxu1 %v1649_v35  ;;  %764 = vmatprep.mubr.f32.mxu0 %v76_v25  ;;  %v279_v35 = vld [vmem:[#allocation5 + $0x5f0] sm:$0xff]  ;;  %v1415_v40 = vpack.c.bf16 %v277_v32, %v273_v31  ;;  %v1433_v26 = vpack.c.bf16 %v318_v21, %v314_v20  ;;  %v313_v27 = vld [vmem:[#allocation5 + $0x700] sm:$0xff]  ;;  %v322_v32 = vld [vmem:[#allocation5 + $0x748] sm:$0xff] }
  0x98   :  { %1072 = vmatprep.mubr.f32.mxu1 %v76_v25  ;;  %v319_v31 = vld [vmem:[#allocation5 + $0x730] sm:$0xff]  ;;  %v321_v39 = vld [vmem:[#allocation5 + $0x740] sm:$0xff]  ;;  %v354_v16 = vld [vmem:[#allocation5 + $0x848] sm:$0xff] }
  0x99   :  { %1396 = vmatpush1.bf16.msra.mxu0 %v1395_v41  ;;  %v1671_v41 = vpack.c.bf16 %v279_v35, %v275_v33  ;;  %v326_v33 = vld [vmem:[#allocation5 + $0x768] sm:$0xff]  ;;  %v328_v35 = vld [vmem:[#allocation5 + $0x778] sm:$0xff]  ;;  %v329_v51 = vld [vmem:[#allocation5 + $0x780] sm:$0xff] }
  0x9a   :  { %1652 = vmatpush1.bf16.msra.mxu1 %v1651_v42  ;;  %1398 = vmatprep.subr.bf16.mxu0 %v1397_v43  ;;  %v1417_v42 = vpack.c.bf16 %v286_v37, %v282_v36  ;;  %v281_v43 = vld [vmem:[#allocation5 + $0x600] sm:$0xff]  ;;  %v1437_v38 = vpack.c.bf16 %v326_v33, %v322_v32  ;;  %v351_v15 = vld [vmem:[#allocation5 + $0x830] sm:$0xff]  ;;  %v368_v32 = vld [vmem:[#allocation5 + $0x8b8] sm:$0xff] }
  0x9b   :  { %1654 = vmatprep.subr.bf16.mxu1 %v1653_v47  ;;  %v287_v47 = vld [vmem:[#allocation5 + $0x630] sm:$0xff]  ;;  %v1419_v52 = vpack.c.bf16 %v285_v44, %v281_v43  ;;  %v330_v44 = vld [vmem:[#allocation5 + $0x788] sm:$0xff]  ;;  %v337_v63 = vld [vmem:[#allocation5 + $0x7c0] sm:$0xff] }
  0x9c   :  { %v327_v43 = vld [vmem:[#allocation5 + $0x770] sm:$0xff]  ;;  %v84_v33 = vld [vmem:[#allocation3 + $0x58] sm:$0xff] }
  0x9d   :  { %1400 = vmatpush1.bf16.msra.mxu0 %v1399_v53  ;;  %v1675_v53 = vpack.c.bf16 %v287_v47, %v283_v45  ;;  %v334_v45 = vld [vmem:[#allocation5 + $0x7a8] sm:$0xff]  ;;  %v336_v47 = vld [vmem:[#allocation5 + $0x7b8] sm:$0xff]  ;;  %v75_v20 = vld [vmem:[#allocation3 + $0x10] sm:$0xff] }
  0x9e   :  { %1656 = vmatpush1.bf16.msra.mxu1 %v1655_v54  ;;  %1402 = vmatprep.subr.bf16.mxu0 %v1401_v55  ;;  %v1421_v54 = vpack.c.bf16 %v294_v49, %v290_v48  ;;  %v289_v55 = vld [vmem:[#allocation5 + $0x640] sm:$0xff]  ;;  %v1441_v50 = vpack.c.bf16 %v334_v45, %v330_v44  ;;  %v374_v44 = vld [vmem:[#allocation5 + $0x8e8] sm:$0xff]  ;;  %v372_v45 = vld [vmem:[#allocation5 + $0x8d8] sm:$0xff] }
  0x9f   :  { %1658 = vmatprep.subr.bf16.mxu1 %v1657_v59  ;;  %v295_v59 = vld [vmem:[#allocation5 + $0x670] sm:$0xff]  ;;  %v1423_v0 = vpack.c.bf16 %v293_v56, %v289_v55  ;;  %v338_v56 = vld [vmem:[#allocation5 + $0x7c8] sm:$0xff] }
  0xa0   :  { %v335_v55 = vld [vmem:[#allocation5 + $0x7b0] sm:$0xff] }
  0xa1   :  { %1404 = vmatpush1.bf16.msra.mxu0 %v1403_v1  ;;  %v1679_v1 = vpack.c.bf16 %v295_v59, %v291_v57  ;;  %v342_v57 = vld [vmem:[#allocation5 + $0x7e8] sm:$0xff]  ;;  %v344_v59 = vld [vmem:[#allocation5 + $0x7f8] sm:$0xff] }
  0xa2   :  { %1660 = vmatpush1.bf16.msra.mxu1 %v1659_v2  ;;  %1406 = vmatprep.subr.bf16.mxu0 %v1405_v3  ;;  %v1425_v2 = vpack.c.bf16 %v302_v61, %v298_v60  ;;  %v297_v3 = vld [vmem:[#allocation5 + $0x680] sm:$0xff]  ;;  %v1445_v62 = vpack.c.bf16 %v342_v57, %v338_v56  ;;  %v378_v56 = vld [vmem:[#allocation5 + $0x908] sm:$0xff] }
  0xa3   :  { %1662 = vmatprep.subr.bf16.mxu1 %v1661_v7  ;;  %v303_v7 = vld [vmem:[#allocation5 + $0x6b0] sm:$0xff]  ;;  %v1427_v12 = vpack.c.bf16 %v301_v4, %v297_v3  ;;  %v346_v4 = vld [vmem:[#allocation5 + $0x808] sm:$0xff] }
  0xa4   :  { %v1683_v13 = vpack.c.bf16 %v303_v7, %v299_v5  ;;  %v343_v3 = vld [vmem:[#allocation5 + $0x7f0] sm:$0xff]  ;;  %v350_v5 = vld [vmem:[#allocation5 + $0x828] sm:$0xff]  ;;  %v352_v7 = vld [vmem:[#allocation5 + $0x838] sm:$0xff] }
  0xa5   :  { %1408 = vmatpush1.bf16.msra.mxu0 %v1407_v14  ;;  %v1429_v14 = vpack.c.bf16 %v310_v9, %v306_v8  ;;  %v382_v57 = vld [vmem:[#allocation5 + $0x928] sm:$0xff] }
  0xa6   :  { %1664 = vmatpush1.bf16.msra.mxu1 %v1663_v17  ;;  %1410 = vmatprep.subr.bf16.mxu0 %v1409_v18  ;;  %v307_v17 = vld [vmem:[#allocation5 + $0x6d0] sm:$0xff]  ;;  %v1685_v18 = vpack.c.bf16 %v312_v11, %v308_v10  ;;  %v1449_v10 = vpack.c.bf16 %v350_v5, %v346_v4  ;;  %v345_v11 = vld [vmem:[#allocation5 + $0x800] sm:$0xff]  ;;  %v386_v4 = vld [vmem:[#allocation5 + $0x948] sm:$0xff] }
  0xa7   :  { %1666 = vmatprep.subr.bf16.mxu1 %v1665_v22  ;;  %v316_v22 = vld [vmem:[#allocation5 + $0x718] sm:$0xff]  ;;  %v1687_v25 = vpack.c.bf16 %v311_v19, %v307_v17  ;;  %v358_v17 = vld [vmem:[#allocation5 + $0x868] sm:$0xff] }
  0xa8   :  { %v360_v19 = vld [vmem:[#allocation5 + $0x878] sm:$0xff]  ;;  %v390_v5 = vld [vmem:[#allocation5 + $0x968] sm:$0xff] }
  0xa9   :  { %1412 = vmatpush1.bf16.msra.mxu0 %v1411_v28  ;;  %v317_v28 = vld [vmem:[#allocation5 + $0x720] sm:$0xff] }
  0xaa   :  { %1668 = vmatpush1.bf16.msra.mxu1 %v1667_v29  ;;  %1414 = vmatprep.subr.bf16.mxu0 %v1413_v30  ;;  %v315_v29 = vld [vmem:[#allocation5 + $0x710] sm:$0xff]  ;;  %v1689_v30 = vpack.c.bf16 %v320_v23, %v316_v22  ;;  %v1435_v36 = vpack.c.bf16 %v317_v28, %v313_v27  ;;  %v1453_v23 = vpack.c.bf16 %v358_v17, %v354_v16  ;;  %v394_v16 = vld [vmem:[#allocation5 + $0x988] sm:$0xff] }
  0xab   :  { %1670 = vmatprep.subr.bf16.mxu1 %v1669_v34  ;;  %v324_v34 = vld [vmem:[#allocation5 + $0x758] sm:$0xff]  ;;  %v1691_v37 = vpack.c.bf16 %v319_v31, %v315_v29  ;;  %v359_v28 = vld [vmem:[#allocation5 + $0x870] sm:$0xff]  ;;  %v362_v29 = vld [vmem:[#allocation5 + $0x888] sm:$0xff] }
  0xac   :  { %v364_v31 = vld [vmem:[#allocation5 + $0x898] sm:$0xff]  ;;  %v398_v17 = vld [vmem:[#allocation5 + $0x9a8] sm:$0xff] }
  0xad   :  { %1416 = vmatpush1.bf16.msra.mxu0 %v1415_v40  ;;  %v325_v40 = vld [vmem:[#allocation5 + $0x760] sm:$0xff] }
  0xae   :  { %1672 = vmatpush1.bf16.msra.mxu1 %v1671_v41  ;;  %1418 = vmatprep.subr.bf16.mxu0 %v1417_v42  ;;  %v323_v41 = vld [vmem:[#allocation5 + $0x750] sm:$0xff]  ;;  %v1693_v42 = vpack.c.bf16 %v328_v35, %v324_v34  ;;  %v1439_v48 = vpack.c.bf16 %v325_v40, %v321_v39  ;;  %v365_v39 = vld [vmem:[#allocation5 + $0x8a0] sm:$0xff] }
  0xaf   :  { %1674 = vmatprep.subr.bf16.mxu1 %v1673_v46  ;;  %v332_v46 = vld [vmem:[#allocation5 + $0x798] sm:$0xff]  ;;  %v1695_v49 = vpack.c.bf16 %v327_v43, %v323_v41  ;;  %v83_v35 = vld [vmem:[#allocation3 + $0x50] sm:$0xff]  ;;  %v1713_v41 = vpack.c.bf16 %v368_v32, %v364_v31  ;;  %v370_v43 = vld [vmem:[#allocation5 + $0x8c8] sm:$0xff] }
  0xb0   :  { %v363_v40 = vld [vmem:[#allocation5 + $0x890] sm:$0xff]  ;;  %v408_v31 = vld [vmem:[#allocation5 + $0x9f8] sm:$0xff] }
  0xb1   :  { %1420 = vmatpush1.bf16.msra.mxu0 %v1419_v52  ;;  %v333_v52 = vld [vmem:[#allocation5 + $0x7a0] sm:$0xff] }
  0xb2   :  { %1676 = vmatpush1.bf16.msra.mxu1 %v1675_v53  ;;  %1422 = vmatprep.subr.bf16.mxu0 %v1421_v54  ;;  %v331_v53 = vld [vmem:[#allocation5 + $0x790] sm:$0xff]  ;;  %v1697_v54 = vpack.c.bf16 %v336_v47, %v332_v46  ;;  %v1443_v60 = vpack.c.bf16 %v333_v52, %v329_v51  ;;  %v376_v46 = vld [vmem:[#allocation5 + $0x8f8] sm:$0xff]  ;;  %v78_v47 = vld [vmem:[#allocation3 + $0x28] sm:$0xff] }
  0xb3   :  { %1678 = vmatprep.subr.bf16.mxu1 %v1677_v58  ;;  %v340_v58 = vld [vmem:[#allocation5 + $0x7d8] sm:$0xff]  ;;  %v1699_v61 = vpack.c.bf16 %v335_v55, %v331_v53  ;;  %v369_v51 = vld [vmem:[#allocation5 + $0x8c0] sm:$0xff]  ;;  %v371_v53 = vld [vmem:[#allocation5 + $0x8d0] sm:$0xff] }
  0xb4   :  { %v373_v52 = vld [vmem:[#allocation5 + $0x8e0] sm:$0xff]  ;;  %v375_v55 = vld [vmem:[#allocation5 + $0x8f0] sm:$0xff] }
  0xb5   :  { %1424 = vmatpush1.bf16.msra.mxu0 %v1423_v0  ;;  %v341_v0 = vld [vmem:[#allocation5 + $0x7e0] sm:$0xff] }
  0xb6   :  { %1680 = vmatpush1.bf16.msra.mxu1 %v1679_v1  ;;  %1426 = vmatprep.subr.bf16.mxu0 %v1425_v2  ;;  %v339_v1 = vld [vmem:[#allocation5 + $0x7d0] sm:$0xff]  ;;  %v1701_v2 = vpack.c.bf16 %v344_v59, %v340_v58  ;;  %v1447_v8 = vpack.c.bf16 %v341_v0, %v337_v63  ;;  %v380_v58 = vld [vmem:[#allocation5 + $0x918] sm:$0xff]  ;;  %v377_v63 = vld [vmem:[#allocation5 + $0x900] sm:$0xff] }
  0xb7   :  { %1682 = vmatprep.subr.bf16.mxu1 %v1681_v6  ;;  %v348_v6 = vld [vmem:[#allocation5 + $0x818] sm:$0xff]  ;;  %v1703_v9 = vpack.c.bf16 %v343_v3, %v339_v1  ;;  %v381_v0 = vld [vmem:[#allocation5 + $0x920] sm:$0xff]  ;;  %v379_v1 = vld [vmem:[#allocation5 + $0x910] sm:$0xff] }
  0xb8   :  { %v384_v59 = vld [vmem:[#allocation5 + $0x938] sm:$0xff]  ;;  %v383_v3 = vld [vmem:[#allocation5 + $0x930] sm:$0xff] }
  0xb9   :  { %1428 = vmatpush1.bf16.msra.mxu0 %v1427_v12  ;;  %v349_v12 = vld [vmem:[#allocation5 + $0x820] sm:$0xff] }
  0xba   :  { %1684 = vmatpush1.bf16.msra.mxu1 %v1683_v13  ;;  %1430 = vmatprep.subr.bf16.mxu0 %v1429_v14  ;;  %v347_v13 = vld [vmem:[#allocation5 + $0x810] sm:$0xff]  ;;  %v1705_v14 = vpack.c.bf16 %v352_v7, %v348_v6  ;;  %v1451_v21 = vpack.c.bf16 %v349_v12, %v345_v11  ;;  %v388_v6 = vld [vmem:[#allocation5 + $0x958] sm:$0xff]  ;;  %v385_v11 = vld [vmem:[#allocation5 + $0x940] sm:$0xff] }
  0xbb   :  { %1686 = vmatprep.subr.bf16.mxu1 %v1685_v18  ;;  %v356_v18 = vld [vmem:[#allocation5 + $0x858] sm:$0xff]  ;;  %v1707_v22 = vpack.c.bf16 %v351_v15, %v347_v13  ;;  %v389_v12 = vld [vmem:[#allocation5 + $0x960] sm:$0xff]  ;;  %v387_v13 = vld [vmem:[#allocation5 + $0x950] sm:$0xff] }
  0xbc   :  { %v1709_v27 = vpack.c.bf16 %v360_v19, %v356_v18  ;;  %v392_v7 = vld [vmem:[#allocation5 + $0x978] sm:$0xff]  ;;  %v391_v15 = vld [vmem:[#allocation5 + $0x970] sm:$0xff] }
  0xbd   :  { %1432 = vmatpush1.bf16.msra.mxu0 %v1431_v24  ;;  %v353_v24 = vld [vmem:[#allocation5 + $0x840] sm:$0xff]  ;;  %v396_v18 = vld [vmem:[#allocation5 + $0x998] sm:$0xff] }
  0xbe   :  { %1688 = vmatpush1.bf16.msra.mxu1 %v1687_v25  ;;  %1434 = vmatprep.subr.bf16.mxu0 %v1433_v26  ;;  %v357_v25 = vld [vmem:[#allocation5 + $0x860] sm:$0xff]  ;;  %v355_v26 = vld [vmem:[#allocation5 + $0x850] sm:$0xff]  ;;  %v400_v19 = vld [vmem:[#allocation5 + $0x9b8] sm:$0xff] }
  0xbf   :  { %1690 = vmatprep.subr.bf16.mxu1 %v1689_v30  ;;  %v366_v30 = vld [vmem:[#allocation5 + $0x8a8] sm:$0xff]  ;;  %v1455_v34 = vpack.c.bf16 %v357_v25, %v353_v24  ;;  %v397_v24 = vld [vmem:[#allocation5 + $0x9a0] sm:$0xff]  ;;  %v395_v25 = vld [vmem:[#allocation5 + $0x990] sm:$0xff] }
  0xc1   :  { %1436 = vmatpush1.bf16.msra.mxu0 %v1435_v36  ;;  %v1711_v36 = vpack.c.bf16 %v359_v28, %v355_v26  ;;  %v1729_v26 = vpack.c.bf16 %v400_v19, %v396_v18  ;;  %v402_v28 = vld [vmem:[#allocation5 + $0x9c8] sm:$0xff]  ;;  %v433_v19 = vld [vmem:[#allocation5 + $0xac0] sm:$0xff] }
  0xc2   :  { %1692 = vmatpush1.bf16.msra.mxu1 %v1691_v37  ;;  %1438 = vmatprep.subr.bf16.mxu0 %v1437_v38  ;;  %v1457_v37 = vpack.c.bf16 %v366_v30, %v362_v29  ;;  %v361_v38 = vld [vmem:[#allocation5 + $0x880] sm:$0xff]  ;;  %v406_v29 = vld [vmem:[#allocation5 + $0x9e8] sm:$0xff]  ;;  %v404_v30 = vld [vmem:[#allocation5 + $0x9d8] sm:$0xff] }
  0xc3   :  { %1694 = vmatprep.subr.bf16.mxu1 %v1693_v42  ;;  %v367_v42 = vld [vmem:[#allocation5 + $0x8b0] sm:$0xff] }
  0xc5   :  { %1440 = vmatpush1.bf16.msra.mxu0 %v1439_v48  ;;  %v1459_v48 = vpack.c.bf16 %v365_v39, %v361_v38  ;;  %v1733_v38 = vpack.c.bf16 %v408_v31, %v404_v30  ;;  %v407_v39 = vld [vmem:[#allocation5 + $0x9f0] sm:$0xff]  ;;  %v441_v31 = vld [vmem:[#allocation5 + $0xb00] sm:$0xff] }
  0xc6   :  { %1696 = vmatpush1.bf16.msra.mxu1 %v1695_v49  ;;  %1442 = vmatprep.subr.bf16.mxu0 %v1441_v50  ;;  %v1715_v49 = vpack.c.bf16 %v367_v42, %v363_v40  ;;  %v1461_v50 = vpack.c.bf16 %v374_v44, %v370_v43  ;;  %v410_v40 = vld [vmem:[#allocation5 + $0xa08] sm:$0xff]  ;;  %v412_v42 = vld [vmem:[#allocation5 + $0xa18] sm:$0xff] }
  0xc7   :  { %1698 = vmatprep.subr.bf16.mxu1 %v1697_v54  ;;  %v1717_v54 = vpack.c.bf16 %v376_v46, %v372_v45  ;;  %v416_v43 = vld [vmem:[#allocation5 + $0xa38] sm:$0xff] }
  0xc9   :  { %1444 = vmatpush1.bf16.msra.mxu0 %v1443_v60  ;;  %v1463_v60 = vpack.c.bf16 %v373_v52, %v369_v51  ;;  %v415_v51 = vld [vmem:[#allocation5 + $0xa30] sm:$0xff]  ;;  %v418_v52 = vld [vmem:[#allocation5 + $0xa48] sm:$0xff] }
  0xca   :  { %1700 = vmatpush1.bf16.msra.mxu1 %v1699_v61  ;;  %1446 = vmatprep.subr.bf16.mxu0 %v1445_v62  ;;  %v1719_v61 = vpack.c.bf16 %v375_v55, %v371_v53  ;;  %v1465_v62 = vpack.c.bf16 %v382_v57, %v378_v56  ;;  %v422_v53 = vld [vmem:[#allocation5 + $0xa68] sm:$0xff]  ;;  %v424_v55 = vld [vmem:[#allocation5 + $0xa78] sm:$0xff] }
  0xcb   :  { %1702 = vmatprep.subr.bf16.mxu1 %v1701_v2  ;;  %v1721_v2 = vpack.c.bf16 %v384_v59, %v380_v58  ;;  %v1485_v58 = vpack.c.bf16 %v422_v53, %v418_v52  ;;  %v417_v59 = vld [vmem:[#allocation5 + $0xa40] sm:$0xff] }
  0xcd   :  { %1448 = vmatpush1.bf16.msra.mxu0 %v1447_v8  ;;  %v1467_v8 = vpack.c.bf16 %v381_v0, %v377_v63  ;;  %v423_v63 = vld [vmem:[#allocation5 + $0xa70] sm:$0xff]  ;;  %v426_v0 = vld [vmem:[#allocation5 + $0xa88] sm:$0xff] }
  0xce   :  { %1704 = vmatpush1.bf16.msra.mxu1 %v1703_v9  ;;  %1450 = vmatprep.subr.bf16.mxu0 %v1449_v10  ;;  %v1723_v9 = vpack.c.bf16 %v383_v3, %v379_v1  ;;  %v1469_v10 = vpack.c.bf16 %v390_v5, %v386_v4  ;;  %v430_v1 = vld [vmem:[#allocation5 + $0xaa8] sm:$0xff]  ;;  %v432_v3 = vld [vmem:[#allocation5 + $0xab8] sm:$0xff] }
  0xcf   :  { %1706 = vmatprep.subr.bf16.mxu1 %v1705_v14  ;;  %v1725_v14 = vpack.c.bf16 %v392_v7, %v388_v6  ;;  %v1489_v6 = vpack.c.bf16 %v430_v1, %v426_v0  ;;  %v425_v7 = vld [vmem:[#allocation5 + $0xa80] sm:$0xff] }
  0xd0   :  { %765 = vmatmul.mubr.f32.vlgmr.msra.gmra.mrb[0].mxu0 %v75_v20 }
  0xd1   :  { %1452 = vmatpush1.bf16.msra.mxu0 %v1451_v21  ;;  %1073 = vmatmul.mubr.f32.vlgmr.msra.gmra.mrb[0].mxu1 %v75_v20  ;;  %v1471_v20 = vpack.c.bf16 %v389_v12, %v385_v11  ;;  %v1727_v21 = vpack.c.bf16 %v391_v15, %v387_v13  ;;  %v431_v11 = vld [vmem:[#allocation5 + $0xab0] sm:$0xff]  ;;  %v434_v12 = vld [vmem:[#allocation5 + $0xac8] sm:$0xff]  ;;  %v440_v15 = vld [vmem:[#allocation5 + $0xaf8] sm:$0xff] }
  0xd2   :  { %1708 = vmatpush1.bf16.msra.mxu1 %v1707_v22  ;;  %1454 = vmatprep.subr.bf16.mxu0 %v1453_v23  ;;  %v1473_v22 = vpack.c.bf16 %v398_v17, %v394_v16  ;;  %v393_v23 = vld [vmem:[#allocation5 + $0x980] sm:$0xff]  ;;  %v438_v13 = vld [vmem:[#allocation5 + $0xae8] sm:$0xff] }
  0xd3   :  { %1710 = vmatprep.subr.bf16.mxu1 %v1709_v27  ;;  %770 = vmatprep.mubr.f32.mxu0 %v84_v33  ;;  %v399_v27 = vld [vmem:[#allocation5 + $0x9b0] sm:$0xff]  ;;  %v1475_v32 = vpack.c.bf16 %v397_v24, %v393_v23  ;;  %v1493_v18 = vpack.c.bf16 %v438_v13, %v434_v12  ;;  %v442_v24 = vld [vmem:[#allocation5 + $0xb08] sm:$0xff] }
  0xd4   :  { %1078 = vmatprep.mubr.f32.mxu1 %v84_v33  ;;  %771 = vmatmul.mubr.f32.gmra.mrb[2].mxu0 %v83_v35  ;;  %v1731_v33 = vpack.c.bf16 %v399_v27, %v395_v25  ;;  %v439_v23 = vld [vmem:[#allocation5 + $0xaf0] sm:$0xff]  ;;  %v446_v25 = vld [vmem:[#allocation5 + $0xb28] sm:$0xff]  ;;  %v448_v27 = vld [vmem:[#allocation5 + $0xb38] sm:$0xff] }
  0xd5   :  { %1456 = vmatpush1.bf16.msra.mxu0 %v1455_v34  ;;  %1079 = vmatmul.mubr.f32.gmra.mrb[2].mxu1 %v83_v35  ;;  %v1477_v34 = vpack.c.bf16 %v406_v29, %v402_v28  ;;  %v401_v35 = vld [vmem:[#allocation5 + $0x9c0] sm:$0xff]  ;;  %v1497_v30 = vpack.c.bf16 %v446_v25, %v442_v24 }
  0xd6   :  { %1712 = vmatpush1.bf16.msra.mxu1 %v1711_v36  ;;  %1458 = vmatprep.subr.bf16.mxu0 %v1457_v37  ;;  %v405_v36 = vld [vmem:[#allocation5 + $0x9e0] sm:$0xff]  ;;  %v403_v37 = vld [vmem:[#allocation5 + $0x9d0] sm:$0xff] }
  0xd7   :  { %1714 = vmatprep.subr.bf16.mxu1 %v1713_v41  ;;  %841 = vmatprep.mubr.f32.mxu0 %v78_v47  ;;  %v414_v41 = vld [vmem:[#allocation5 + $0xa28] sm:$0xff]  ;;  %v1479_v44 = vpack.c.bf16 %v405_v36, %v401_v35  ;;  %v1735_v45 = vpack.c.bf16 %v407_v39, %v403_v37  ;;  %v447_v35 = vld [vmem:[#allocation5 + $0xb30] sm:$0xff]  ;;  %v456_v39 = vld [vmem:[#allocation5 + $0xb78] sm:$0xff] }
  0xd8   :  { %1149 = vmatprep.mubr.f32.mxu1 %v78_v47  ;;  %v1481_v46 = vpack.c.bf16 %v414_v41, %v410_v40  ;;  %v409_v47 = vld [vmem:[#allocation5 + $0xa00] sm:$0xff]  ;;  %v450_v36 = vld [vmem:[#allocation5 + $0xb48] sm:$0xff] }
  0xd9   :  { %1460 = vmatpush1.bf16.msra.mxu0 %v1459_v48  ;;  %v413_v48 = vld [vmem:[#allocation5 + $0xa20] sm:$0xff]  ;;  %v454_v37 = vld [vmem:[#allocation5 + $0xb68] sm:$0xff] }
  0xda   :  { %1716 = vmatpush1.bf16.msra.mxu1 %v1715_v49  ;;  %1462 = vmatprep.subr.bf16.mxu0 %v1461_v50  ;;  %v411_v49 = vld [vmem:[#allocation5 + $0xa10] sm:$0xff]  ;;  %v1737_v50 = vpack.c.bf16 %v416_v43, %v412_v42  ;;  %v1483_v56 = vpack.c.bf16 %v413_v48, %v409_v47  ;;  %v1501_v42 = vpack.c.bf16 %v454_v37, %v450_v36  ;;  %v449_v43 = vld [vmem:[#allocation5 + $0xb40] sm:$0xff]  ;;  %v458_v48 = vld [vmem:[#allocation5 + $0xb88] sm:$0xff] }
  0xdb   :  { %1718 = vmatprep.subr.bf16.mxu1 %v1717_v54  ;;  %v420_v54 = vld [vmem:[#allocation5 + $0xa58] sm:$0xff]  ;;  %v1739_v57 = vpack.c.bf16 %v415_v51, %v411_v49  ;;  %v455_v47 = vld [vmem:[#allocation5 + $0xb70] sm:$0xff]  ;;  %v462_v49 = vld [vmem:[#allocation5 + $0xba8] sm:$0xff] }
  0xdc   :  { %v464_v51 = vld [vmem:[#allocation5 + $0xbb8] sm:$0xff]  ;;  %v77_v24 = vld [vmem:[#allocation3 + $0x20] sm:$0xff]  ;;  %v86_v37 = vld [vmem:[#allocation3 + $0x68] sm:$0xff] }
  0xdd   :  { %1464 = vmatpush1.bf16.msra.mxu0 %v1463_v60  ;;  %v421_v60 = vld [vmem:[#allocation5 + $0xa60] sm:$0xff]  ;;  %v496_v36 = vld [vmem:[#allocation5 + $0xcb8] sm:$0xff] }
  0xde   :  { %1720 = vmatpush1.bf16.msra.mxu1 %v1719_v61  ;;  %1466 = vmatprep.subr.bf16.mxu0 %v1465_v62  ;;  %v419_v61 = vld [vmem:[#allocation5 + $0xa50] sm:$0xff]  ;;  %v1741_v62 = vpack.c.bf16 %v424_v55, %v420_v54  ;;  %v1487_v4 = vpack.c.bf16 %v421_v60, %v417_v59  ;;  %v1505_v54 = vpack.c.bf16 %v462_v49, %v458_v48  ;;  %v457_v55 = vld [vmem:[#allocation5 + $0xb80] sm:$0xff]  ;;  %v466_v60 = vld [vmem:[#allocation5 + $0xbc8] sm:$0xff] }
  0xdf   :  { %1722 = vmatprep.subr.bf16.mxu1 %v1721_v2  ;;  %v428_v2 = vld [vmem:[#allocation5 + $0xa98] sm:$0xff]  ;;  %v1743_v5 = vpack.c.bf16 %v423_v63, %v419_v61  ;;  %v463_v59 = vld [vmem:[#allocation5 + $0xbb0] sm:$0xff]  ;;  %v470_v61 = vld [vmem:[#allocation5 + $0xbe8] sm:$0xff] }
  0xe0   :  { %v472_v63 = vld [vmem:[#allocation5 + $0xbf8] sm:$0xff]  ;;  %v502_v48 = vld [vmem:[#allocation5 + $0xce8] sm:$0xff] }
  0xe1   :  { %1468 = vmatpush1.bf16.msra.mxu0 %v1467_v8  ;;  %v429_v8 = vld [vmem:[#allocation5 + $0xaa0] sm:$0xff]  ;;  %v500_v49 = vld [vmem:[#allocation5 + $0xcd8] sm:$0xff] }
  0xe2   :  { %1724 = vmatpush1.bf16.msra.mxu1 %v1723_v9  ;;  %1470 = vmatprep.subr.bf16.mxu0 %v1469_v10  ;;  %v427_v9 = vld [vmem:[#allocation5 + $0xa90] sm:$0xff]  ;;  %v1745_v10 = vpack.c.bf16 %v432_v3, %v428_v2  ;;  %v1491_v16 = vpack.c.bf16 %v429_v8, %v425_v7  ;;  %v1509_v2 = vpack.c.bf16 %v470_v61, %v466_v60  ;;  %v465_v3 = vld [vmem:[#allocation5 + $0xbc0] sm:$0xff]  ;;  %v474_v8 = vld [vmem:[#allocation5 + $0xc08] sm:$0xff] }
  0xe3   :  { %1726 = vmatprep.subr.bf16.mxu1 %v1725_v14  ;;  %v436_v14 = vld [vmem:[#allocation5 + $0xad8] sm:$0xff]  ;;  %v1747_v17 = vpack.c.bf16 %v431_v11, %v427_v9  ;;  %v471_v7 = vld [vmem:[#allocation5 + $0xbf0] sm:$0xff]  ;;  %v478_v9 = vld [vmem:[#allocation5 + $0xc28] sm:$0xff] }
  0xe4   :  { %v480_v11 = vld [vmem:[#allocation5 + $0xc38] sm:$0xff]  ;;  %v506_v60 = vld [vmem:[#allocation5 + $0xd08] sm:$0xff] }
  0xe5   :  { %1472 = vmatpush1.bf16.msra.mxu0 %v1471_v20  ;;  %v437_v20 = vld [vmem:[#allocation5 + $0xae0] sm:$0xff]  ;;  %v510_v61 = vld [vmem:[#allocation5 + $0xd28] sm:$0xff] }
  0xe6   :  { %1728 = vmatpush1.bf16.msra.mxu1 %v1727_v21  ;;  %1474 = vmatprep.subr.bf16.mxu0 %v1473_v22  ;;  %v435_v21 = vld [vmem:[#allocation5 + $0xad0] sm:$0xff]  ;;  %v1749_v22 = vpack.c.bf16 %v440_v15, %v436_v14  ;;  %v1495_v28 = vpack.c.bf16 %v437_v20, %v433_v19  ;;  %v1513_v14 = vpack.c.bf16 %v478_v9, %v474_v8  ;;  %v473_v15 = vld [vmem:[#allocation5 + $0xc00] sm:$0xff]  ;;  %v482_v20 = vld [vmem:[#allocation5 + $0xc48] sm:$0xff] }
  0xe7   :  { %1730 = vmatprep.subr.bf16.mxu1 %v1729_v26  ;;  %v444_v26 = vld [vmem:[#allocation5 + $0xb18] sm:$0xff]  ;;  %v1751_v29 = vpack.c.bf16 %v439_v23, %v435_v21  ;;  %v479_v19 = vld [vmem:[#allocation5 + $0xc30] sm:$0xff]  ;;  %v486_v21 = vld [vmem:[#allocation5 + $0xc68] sm:$0xff] }
  0xe8   :  { %v488_v23 = vld [vmem:[#allocation5 + $0xc78] sm:$0xff]  ;;  %v514_v8 = vld [vmem:[#allocation5 + $0xd48] sm:$0xff] }
  0xe9   :  { %1476 = vmatpush1.bf16.msra.mxu0 %v1475_v32  ;;  %v445_v32 = vld [vmem:[#allocation5 + $0xb20] sm:$0xff]  ;;  %v518_v9 = vld [vmem:[#allocation5 + $0xd68] sm:$0xff] }
  0xea   :  { %1732 = vmatpush1.bf16.msra.mxu1 %v1731_v33  ;;  %1478 = vmatprep.subr.bf16.mxu0 %v1477_v34  ;;  %v443_v33 = vld [vmem:[#allocation5 + $0xb10] sm:$0xff]  ;;  %v1753_v34 = vpack.c.bf16 %v448_v27, %v444_v26  ;;  %v1499_v40 = vpack.c.bf16 %v445_v32, %v441_v31  ;;  %v1517_v27 = vpack.c.bf16 %v486_v21, %v482_v20  ;;  %v522_v20 = vld [vmem:[#allocation5 + $0xd88] sm:$0xff] }
  0xeb   :  { %1734 = vmatprep.subr.bf16.mxu1 %v1733_v38  ;;  %v452_v38 = vld [vmem:[#allocation5 + $0xb58] sm:$0xff]  ;;  %v1755_v41 = vpack.c.bf16 %v447_v35, %v443_v33  ;;  %v487_v32 = vld [vmem:[#allocation5 + $0xc70] sm:$0xff]  ;;  %v490_v33 = vld [vmem:[#allocation5 + $0xc88] sm:$0xff] }
  0xec   :  { %v492_v35 = vld [vmem:[#allocation5 + $0xc98] sm:$0xff]  ;;  %v526_v21 = vld [vmem:[#allocation5 + $0xda8] sm:$0xff] }
  0xed   :  { %1480 = vmatpush1.bf16.msra.mxu0 %v1479_v44  ;;  %v453_v44 = vld [vmem:[#allocation5 + $0xb60] sm:$0xff] }
  0xee   :  { %1736 = vmatpush1.bf16.msra.mxu1 %v1735_v45  ;;  %1482 = vmatprep.subr.bf16.mxu0 %v1481_v46  ;;  %v451_v45 = vld [vmem:[#allocation5 + $0xb50] sm:$0xff]  ;;  %v1757_v46 = vpack.c.bf16 %v456_v39, %v452_v38  ;;  %v1503_v52 = vpack.c.bf16 %v453_v44, %v449_v43  ;;  %v85_v39 = vld [vmem:[#allocation3 + $0x60] sm:$0xff] }
  0xef   :  { %1738 = vmatprep.subr.bf16.mxu1 %v1737_v50  ;;  %v460_v50 = vld [vmem:[#allocation5 + $0xb98] sm:$0xff]  ;;  %v1759_v53 = vpack.c.bf16 %v455_v47, %v451_v45  ;;  %v493_v43 = vld [vmem:[#allocation5 + $0xca0] sm:$0xff]  ;;  %v491_v44 = vld [vmem:[#allocation5 + $0xc90] sm:$0xff]  ;;  %v1777_v45 = vpack.c.bf16 %v496_v36, %v492_v35 }
  0xf0   :  { %v498_v47 = vld [vmem:[#allocation5 + $0xcc8] sm:$0xff]  ;;  %v536_v35 = vld [vmem:[#allocation5 + $0xdf8] sm:$0xff] }
  0xf1   :  { %1484 = vmatpush1.bf16.msra.mxu0 %v1483_v56  ;;  %v461_v56 = vld [vmem:[#allocation5 + $0xba0] sm:$0xff] }
  0xf2   :  { %1740 = vmatpush1.bf16.msra.mxu1 %v1739_v57  ;;  %1486 = vmatprep.subr.bf16.mxu0 %v1485_v58  ;;  %v459_v57 = vld [vmem:[#allocation5 + $0xb90] sm:$0xff]  ;;  %v1761_v58 = vpack.c.bf16 %v464_v51, %v460_v50  ;;  %v1507_v0 = vpack.c.bf16 %v461_v56, %v457_v55  ;;  %v504_v50 = vld [vmem:[#allocation5 + $0xcf8] sm:$0xff]  ;;  %v497_v55 = vld [vmem:[#allocation5 + $0xcc0] sm:$0xff] }
  0xf3   :  { %1742 = vmatprep.subr.bf16.mxu1 %v1741_v62  ;;  %v468_v62 = vld [vmem:[#allocation5 + $0xbd8] sm:$0xff]  ;;  %v1763_v1 = vpack.c.bf16 %v463_v59, %v459_v57  ;;  %v501_v56 = vld [vmem:[#allocation5 + $0xce0] sm:$0xff]  ;;  %v499_v57 = vld [vmem:[#allocation5 + $0xcd0] sm:$0xff] }
  0xf4   :  { %v80_v51 = vld [vmem:[#allocation3 + $0x38] sm:$0xff]  ;;  %v503_v59 = vld [vmem:[#allocation5 + $0xcf0] sm:$0xff] }
  0xf5   :  { %1488 = vmatpush1.bf16.msra.mxu0 %v1487_v4  ;;  %v469_v4 = vld [vmem:[#allocation5 + $0xbe0] sm:$0xff] }
  0xf6   :  { %1744 = vmatpush1.bf16.msra.mxu1 %v1743_v5  ;;  %1490 = vmatprep.subr.bf16.mxu0 %v1489_v6  ;;  %v467_v5 = vld [vmem:[#allocation5 + $0xbd0] sm:$0xff]  ;;  %v1765_v6 = vpack.c.bf16 %v472_v63, %v468_v62  ;;  %v1511_v12 = vpack.c.bf16 %v469_v4, %v465_v3  ;;  %v508_v62 = vld [vmem:[#allocation5 + $0xd18] sm:$0xff]  ;;  %v505_v3 = vld [vmem:[#allocation5 + $0xd00] sm:$0xff] }
  0xf7   :  { %1746 = vmatprep.subr.bf16.mxu1 %v1745_v10  ;;  %v476_v10 = vld [vmem:[#allocation5 + $0xc18] sm:$0xff]  ;;  %v1767_v13 = vpack.c.bf16 %v471_v7, %v467_v5  ;;  %v509_v4 = vld [vmem:[#allocation5 + $0xd20] sm:$0xff]  ;;  %v507_v5 = vld [vmem:[#allocation5 + $0xd10] sm:$0xff] }
  0xf8   :  { %v512_v63 = vld [vmem:[#allocation5 + $0xd38] sm:$0xff]  ;;  %v511_v7 = vld [vmem:[#allocation5 + $0xd30] sm:$0xff] }
  0xf9   :  { %1492 = vmatpush1.bf16.msra.mxu0 %v1491_v16  ;;  %v477_v16 = vld [vmem:[#allocation5 + $0xc20] sm:$0xff] }
  0xfa   :  { %1748 = vmatpush1.bf16.msra.mxu1 %v1747_v17  ;;  %1494 = vmatprep.subr.bf16.mxu0 %v1493_v18  ;;  %v475_v17 = vld [vmem:[#allocation5 + $0xc10] sm:$0xff]  ;;  %v1769_v18 = vpack.c.bf16 %v480_v11, %v476_v10  ;;  %v1515_v25 = vpack.c.bf16 %v477_v16, %v473_v15  ;;  %v516_v10 = vld [vmem:[#allocation5 + $0xd58] sm:$0xff]  ;;  %v513_v15 = vld [vmem:[#allocation5 + $0xd40] sm:$0xff] }
  0xfb   :  { %1750 = vmatprep.subr.bf16.mxu1 %v1749_v22  ;;  %v484_v22 = vld [vmem:[#allocation5 + $0xc58] sm:$0xff]  ;;  %v1771_v26 = vpack.c.bf16 %v479_v19, %v475_v17  ;;  %v517_v16 = vld [vmem:[#allocation5 + $0xd60] sm:$0xff]  ;;  %v515_v17 = vld [vmem:[#allocation5 + $0xd50] sm:$0xff] }
  0xfc   :  { %v1773_v31 = vpack.c.bf16 %v488_v23, %v484_v22  ;;  %v520_v11 = vld [vmem:[#allocation5 + $0xd78] sm:$0xff]  ;;  %v519_v19 = vld [vmem:[#allocation5 + $0xd70] sm:$0xff] }
  0xfd   :  { %1496 = vmatpush1.bf16.msra.mxu0 %v1495_v28  ;;  %v481_v28 = vld [vmem:[#allocation5 + $0xc40] sm:$0xff]  ;;  %v524_v22 = vld [vmem:[#allocation5 + $0xd98] sm:$0xff] }
  0xfe   :  { %1752 = vmatpush1.bf16.msra.mxu1 %v1751_v29  ;;  %1498 = vmatprep.subr.bf16.mxu0 %v1497_v30  ;;  %v485_v29 = vld [vmem:[#allocation5 + $0xc60] sm:$0xff]  ;;  %v483_v30 = vld [vmem:[#allocation5 + $0xc50] sm:$0xff]  ;;  %v528_v23 = vld [vmem:[#allocation5 + $0xdb8] sm:$0xff] }
  0xff   :  { %1754 = vmatprep.subr.bf16.mxu1 %v1753_v34  ;;  %v494_v34 = vld [vmem:[#allocation5 + $0xca8] sm:$0xff]  ;;  %v1519_v38 = vpack.c.bf16 %v485_v29, %v481_v28  ;;  %v525_v28 = vld [vmem:[#allocation5 + $0xda0] sm:$0xff]  ;;  %v523_v29 = vld [vmem:[#allocation5 + $0xd90] sm:$0xff] }
 0x101   :  { %1500 = vmatpush1.bf16.msra.mxu0 %v1499_v40  ;;  %v1775_v40 = vpack.c.bf16 %v487_v32, %v483_v30  ;;  %v1793_v30 = vpack.c.bf16 %v528_v23, %v524_v22  ;;  %v530_v32 = vld [vmem:[#allocation5 + $0xdc8] sm:$0xff]  ;;  %v561_v23 = vld [vmem:[#allocation5 + $0xec0] sm:$0xff] }
 0x102   :  { %1756 = vmatpush1.bf16.msra.mxu1 %v1755_v41  ;;  %1502 = vmatprep.subr.bf16.mxu0 %v1501_v42  ;;  %v1521_v41 = vpack.c.bf16 %v494_v34, %v490_v33  ;;  %v489_v42 = vld [vmem:[#allocation5 + $0xc80] sm:$0xff]  ;;  %v534_v33 = vld [vmem:[#allocation5 + $0xde8] sm:$0xff]  ;;  %v532_v34 = vld [vmem:[#allocation5 + $0xdd8] sm:$0xff] }
 0x103   :  { %1758 = vmatprep.subr.bf16.mxu1 %v1757_v46  ;;  %v495_v46 = vld [vmem:[#allocation5 + $0xcb0] sm:$0xff] }
 0x105   :  { %1504 = vmatpush1.bf16.msra.mxu0 %v1503_v52  ;;  %v1523_v52 = vpack.c.bf16 %v493_v43, %v489_v42  ;;  %v1797_v42 = vpack.c.bf16 %v536_v35, %v532_v34  ;;  %v535_v43 = vld [vmem:[#allocation5 + $0xdf0] sm:$0xff]  ;;  %v569_v35 = vld [vmem:[#allocation5 + $0xf00] sm:$0xff] }
 0x106   :  { %1760 = vmatpush1.bf16.msra.mxu1 %v1759_v53  ;;  %1506 = vmatprep.subr.bf16.mxu0 %v1505_v54  ;;  %v1779_v53 = vpack.c.bf16 %v495_v46, %v491_v44  ;;  %v1525_v54 = vpack.c.bf16 %v502_v48, %v498_v47  ;;  %v538_v44 = vld [vmem:[#allocation5 + $0xe08] sm:$0xff]  ;;  %v540_v46 = vld [vmem:[#allocation5 + $0xe18] sm:$0xff] }
 0x107   :  { %1762 = vmatprep.subr.bf16.mxu1 %v1761_v58  ;;  %v1781_v58 = vpack.c.bf16 %v504_v50, %v500_v49  ;;  %v544_v47 = vld [vmem:[#allocation5 + $0xe38] sm:$0xff] }
 0x109   :  { %1508 = vmatpush1.bf16.msra.mxu0 %v1507_v0  ;;  %v1527_v0 = vpack.c.bf16 %v501_v56, %v497_v55  ;;  %v543_v55 = vld [vmem:[#allocation5 + $0xe30] sm:$0xff]  ;;  %v546_v56 = vld [vmem:[#allocation5 + $0xe48] sm:$0xff] }
 0x10a   :  { %1764 = vmatpush1.bf16.msra.mxu1 %v1763_v1  ;;  %1510 = vmatprep.subr.bf16.mxu0 %v1509_v2  ;;  %v1783_v1 = vpack.c.bf16 %v503_v59, %v499_v57  ;;  %v1529_v2 = vpack.c.bf16 %v510_v61, %v506_v60  ;;  %v550_v57 = vld [vmem:[#allocation5 + $0xe68] sm:$0xff]  ;;  %v552_v59 = vld [vmem:[#allocation5 + $0xe78] sm:$0xff] }
 0x10b   :  { %1766 = vmatprep.subr.bf16.mxu1 %v1765_v6  ;;  %v1785_v6 = vpack.c.bf16 %v512_v63, %v508_v62  ;;  %v1549_v62 = vpack.c.bf16 %v550_v57, %v546_v56  ;;  %v545_v63 = vld [vmem:[#allocation5 + $0xe40] sm:$0xff] }
 0x10d   :  { %1512 = vmatpush1.bf16.msra.mxu0 %v1511_v12  ;;  %v1531_v12 = vpack.c.bf16 %v509_v4, %v505_v3  ;;  %v551_v3 = vld [vmem:[#allocation5 + $0xe70] sm:$0xff]  ;;  %v554_v4 = vld [vmem:[#allocation5 + $0xe88] sm:$0xff] }
 0x10e   :  { %1768 = vmatpush1.bf16.msra.mxu1 %v1767_v13  ;;  %1514 = vmatprep.subr.bf16.mxu0 %v1513_v14  ;;  %v1787_v13 = vpack.c.bf16 %v511_v7, %v507_v5  ;;  %v1533_v14 = vpack.c.bf16 %v518_v9, %v514_v8  ;;  %v558_v5 = vld [vmem:[#allocation5 + $0xea8] sm:$0xff]  ;;  %v560_v7 = vld [vmem:[#allocation5 + $0xeb8] sm:$0xff] }
 0x10f   :  { %1770 = vmatprep.subr.bf16.mxu1 %v1769_v18  ;;  %v1789_v18 = vpack.c.bf16 %v520_v11, %v516_v10  ;;  %v1553_v10 = vpack.c.bf16 %v558_v5, %v554_v4  ;;  %v553_v11 = vld [vmem:[#allocation5 + $0xe80] sm:$0xff] }
 0x110   :  { %842 = vmatmul.mubr.f32.vlgmr.msra.gmra.mrb[0].mxu0 %v77_v24 }
 0x111   :  { %1516 = vmatpush1.bf16.msra.mxu0 %v1515_v25  ;;  %1150 = vmatmul.mubr.f32.vlgmr.msra.gmra.mrb[0].mxu1 %v77_v24  ;;  %v1535_v24 = vpack.c.bf16 %v517_v16, %v513_v15  ;;  %v1791_v25 = vpack.c.bf16 %v519_v19, %v515_v17  ;;  %v559_v15 = vld [vmem:[#allocation5 + $0xeb0] sm:$0xff]  ;;  %v562_v16 = vld [vmem:[#allocation5 + $0xec8] sm:$0xff]  ;;  %v568_v19 = vld [vmem:[#allocation5 + $0xef8] sm:$0xff] }
 0x112   :  { %1772 = vmatpush1.bf16.msra.mxu1 %v1771_v26  ;;  %1518 = vmatprep.subr.bf16.mxu0 %v1517_v27  ;;  %v1537_v26 = vpack.c.bf16 %v526_v21, %v522_v20  ;;  %v521_v27 = vld [vmem:[#allocation5 + $0xd80] sm:$0xff]  ;;  %v566_v17 = vld [vmem:[#allocation5 + $0xee8] sm:$0xff] }
 0x113   :  { %1774 = vmatprep.subr.bf16.mxu1 %v1773_v31  ;;  %847 = vmatprep.mubr.f32.mxu0 %v86_v37  ;;  %v527_v31 = vld [vmem:[#allocation5 + $0xdb0] sm:$0xff]  ;;  %v1539_v36 = vpack.c.bf16 %v525_v28, %v521_v27  ;;  %v1557_v22 = vpack.c.bf16 %v566_v17, %v562_v16  ;;  %v570_v28 = vld [vmem:[#allocation5 + $0xf08] sm:$0xff]  ;;  %v603_v17 = vlaneseq }
 0x114   :  { %1155 = vmatprep.mubr.f32.mxu1 %v86_v37  ;;  %848 = vmatmul.mubr.f32.gmra.mrb[2].mxu0 %v85_v39  ;;  %v1795_v37 = vpack.c.bf16 %v527_v31, %v523_v29  ;;  %v567_v27 = vld [vmem:[#allocation5 + $0xef0] sm:$0xff]  ;;  %v574_v29 = vld [vmem:[#allocation5 + $0xf28] sm:$0xff]  ;;  %v576_v31 = vld [vmem:[#allocation5 + $0xf38] sm:$0xff] }
 0x115   :  { %1520 = vmatpush1.bf16.msra.mxu0 %v1519_v38  ;;  %1156 = vmatmul.mubr.f32.gmra.mrb[2].mxu1 %v85_v39  ;;  %v1541_v38 = vpack.c.bf16 %v534_v33, %v530_v32  ;;  %v529_v39 = vld [vmem:[#allocation5 + $0xdc0] sm:$0xff]  ;;  %v1561_v34 = vpack.c.bf16 %v574_v29, %v570_v28  ;;  %v87_v16 = vld [vmem:[#allocation3 + $0x70] sm:$0xff] }
 0x116   :  { %1776 = vmatpush1.bf16.msra.mxu1 %v1775_v40  ;;  %1522 = vmatprep.subr.bf16.mxu0 %v1521_v41  ;;  %v533_v40 = vld [vmem:[#allocation5 + $0xde0] sm:$0xff]  ;;  %v531_v41 = vld [vmem:[#allocation5 + $0xdd0] sm:$0xff] }
 0x117   :  { %1778 = vmatprep.subr.bf16.mxu1 %v1777_v45  ;;  %918 = vmatprep.mubr.f32.mxu0 %v80_v51  ;;  %v542_v45 = vld [vmem:[#allocation5 + $0xe28] sm:$0xff]  ;;  %v1543_v48 = vpack.c.bf16 %v533_v40, %v529_v39  ;;  %v1799_v49 = vpack.c.bf16 %v535_v43, %v531_v41  ;;  %v575_v39 = vld [vmem:[#allocation5 + $0xf30] sm:$0xff]  ;;  %v584_v43 = vld [vmem:[#allocation5 + $0xf78] sm:$0xff] }
 0x118   :  { %1226 = vmatprep.mubr.f32.mxu1 %v80_v51  ;;  %v1545_v50 = vpack.c.bf16 %v542_v45, %v538_v44  ;;  %v537_v51 = vld [vmem:[#allocation5 + $0xe00] sm:$0xff]  ;;  %v578_v40 = vld [vmem:[#allocation5 + $0xf48] sm:$0xff] }
 0x119   :  { %1524 = vmatpush1.bf16.msra.mxu0 %v1523_v52  ;;  %v541_v52 = vld [vmem:[#allocation5 + $0xe20] sm:$0xff]  ;;  %v582_v41 = vld [vmem:[#allocation5 + $0xf68] sm:$0xff] }
 0x11a   :  { %1780 = vmatpush1.bf16.msra.mxu1 %v1779_v53  ;;  %1526 = vmatprep.subr.bf16.mxu0 %v1525_v54  ;;  %v539_v53 = vld [vmem:[#allocation5 + $0xe10] sm:$0xff]  ;;  %v1801_v54 = vpack.c.bf16 %v544_v47, %v540_v46  ;;  %v1547_v60 = vpack.c.bf16 %v541_v52, %v537_v51  ;;  %v1565_v46 = vpack.c.bf16 %v582_v41, %v578_v40  ;;  %v577_v47 = vld [vmem:[#allocation5 + $0xf40] sm:$0xff]  ;;  %v586_v52 = vld [vmem:[#allocation5 + $0xf88] sm:$0xff] }
 0x11b   :  { %1782 = vmatprep.subr.bf16.mxu1 %v1781_v58  ;;  %v548_v58 = vld [vmem:[#allocation5 + $0xe58] sm:$0xff]  ;;  %v1803_v61 = vpack.c.bf16 %v543_v55, %v539_v53  ;;  %v583_v51 = vld [vmem:[#allocation5 + $0xf70] sm:$0xff]  ;;  %v590_v53 = vld [vmem:[#allocation5 + $0xfa8] sm:$0xff] }
 0x11c   :  { %v592_v55 = vld [vmem:[#allocation5 + $0xfb8] sm:$0xff] }
 0x11d   :  { %1528 = vmatpush1.bf16.msra.mxu0 %v1527_v0  ;;  %v549_v0 = vld [vmem:[#allocation5 + $0xe60] sm:$0xff] }
 0x11e   :  { %1784 = vmatpush1.bf16.msra.mxu1 %v1783_v1  ;;  %1530 = vmatprep.subr.bf16.mxu0 %v1529_v2  ;;  %v547_v1 = vld [vmem:[#allocation5 + $0xe50] sm:$0xff]  ;;  %v1805_v2 = vpack.c.bf16 %v552_v59, %v548_v58  ;;  %v1551_v8 = vpack.c.bf16 %v549_v0, %v545_v63  ;;  %v1569_v58 = vpack.c.bf16 %v590_v53, %v586_v52  ;;  %v585_v59 = vld [vmem:[#allocation5 + $0xf80] sm:$0xff]  ;;  %v594_v0 = vld [vmem:[#allocation5 + $0xfc8] sm:$0xff] }
 0x11f   :  { %1786 = vmatprep.subr.bf16.mxu1 %v1785_v6  ;;  %v556_v6 = vld [vmem:[#allocation5 + $0xe98] sm:$0xff]  ;;  %v1807_v9 = vpack.c.bf16 %v551_v3, %v547_v1  ;;  %v591_v63 = vld [vmem:[#allocation5 + $0xfb0] sm:$0xff]  ;;  %v598_v1 = vld [vmem:[#allocation5 + $0xfe8] sm:$0xff] }
 0x120   :  { %v600_v3 = vld [vmem:[#allocation5 + $0xff8] sm:$0xff] }
 0x121   :  { %1532 = vmatpush1.bf16.msra.mxu0 %v1531_v12  ;;  %v557_v12 = vld [vmem:[#allocation5 + $0xea0] sm:$0xff] }
 0x122   :  { %1788 = vmatpush1.bf16.msra.mxu1 %v1787_v13  ;;  %1534 = vmatprep.subr.bf16.mxu0 %v1533_v14  ;;  %v555_v13 = vld [vmem:[#allocation5 + $0xe90] sm:$0xff]  ;;  %v1809_v14 = vpack.c.bf16 %v560_v7, %v556_v6  ;;  %v1555_v20 = vpack.c.bf16 %v557_v12, %v553_v11  ;;  %v1573_v6 = vpack.c.bf16 %v598_v1, %v594_v0  ;;  %v593_v7 = vld [vmem:[#allocation5 + $0xfc0] sm:$0xff] }
 0x123   :  { %1790 = vmatprep.subr.bf16.mxu1 %v1789_v18  ;;  %v564_v18 = vld [vmem:[#allocation5 + $0xed8] sm:$0xff]  ;;  %v1811_v21 = vpack.c.bf16 %v559_v15, %v555_v13  ;;  %v599_v11 = vld [vmem:[#allocation5 + $0xff0] sm:$0xff] }
 0x124   :  { %v88_v15 = vld [vmem:[#allocation3 + $0x78] sm:$0xff] }
 0x125   :  { %1536 = vmatpush1.bf16.msra.mxu0 %v1535_v24  ;;  %v565_v24 = vld [vmem:[#allocation5 + $0xee0] sm:$0xff] }
 0x126   :  { %1792 = vmatpush1.bf16.msra.mxu1 %v1791_v25  ;;  %1538 = vmatprep.subr.bf16.mxu0 %v1537_v26  ;;  %v563_v25 = vld [vmem:[#allocation5 + $0xed0] sm:$0xff]  ;;  %v1813_v26 = vpack.c.bf16 %v568_v19, %v564_v18  ;;  %v1559_v32 = vpack.c.bf16 %v565_v24, %v561_v23  ;;  %v604_v18 = vshrl.u32 %v603_v17, 7 }
 0x127   :  { %1794 = vmatprep.subr.bf16.mxu1 %v1793_v30  ;;  %v572_v30 = vld [vmem:[#allocation5 + $0xf18] sm:$0xff]  ;;  %v1815_v33 = vpack.c.bf16 %v567_v27, %v563_v25  ;;  %v1247_v25 = vld [vmem:[#allocation8] sm:$0xf] }
 0x128   :  { %v605_v19 = vsub.s32 0, %v604_v18  ;;  %v617_v23 = vsub.s32 3, %v604_v18 }
 0x129   :  { %1540 = vmatpush1.bf16.msra.mxu0 %v1539_v36  ;;  %v573_v36 = vld [vmem:[#allocation5 + $0xf20] sm:$0xff] }
 0x12a   :  { %1796 = vmatpush1.bf16.msra.mxu1 %v1795_v37  ;;  %1542 = vmatprep.subr.bf16.mxu0 %v1541_v38  ;;  %v571_v37 = vld [vmem:[#allocation5 + $0xf10] sm:$0xff]  ;;  %v1817_v38 = vpack.c.bf16 %v576_v31, %v572_v30  ;;  %v1563_v44 = vpack.c.bf16 %v573_v36, %v569_v35  ;;  %v1252_v31 = vrot.slane %v1247_v25, %v605_v19 }
 0x12b   :  { %1798 = vmatprep.subr.bf16.mxu1 %v1797_v42  ;;  %v580_v42 = vld [vmem:[#allocation5 + $0xf58] sm:$0xff]  ;;  %v1819_v45 = vpack.c.bf16 %v575_v39, %v571_v37 }
 0x12d   :  { %1544 = vmatpush1.bf16.msra.mxu0 %v1543_v48  ;;  %v581_v48 = vld [vmem:[#allocation5 + $0xf60] sm:$0xff] }
 0x12e   :  { %1800 = vmatpush1.bf16.msra.mxu1 %v1799_v49  ;;  %1546 = vmatprep.subr.bf16.mxu0 %v1545_v50  ;;  %v579_v49 = vld [vmem:[#allocation5 + $0xf50] sm:$0xff]  ;;  %v1821_v50 = vpack.c.bf16 %v584_v43, %v580_v42  ;;  %v1567_v56 = vpack.c.bf16 %v581_v48, %v577_v47  ;;  %v1264_v48 = vrot.slane %v1247_v25, %v617_v23 }
 0x12f   :  { %1802 = vmatprep.subr.bf16.mxu1 %v1801_v54  ;;  %v588_v54 = vld [vmem:[#allocation5 + $0xf98] sm:$0xff]  ;;  %v1823_v57 = vpack.c.bf16 %v583_v51, %v579_v49 }
 0x131   :  { %1548 = vmatpush1.bf16.msra.mxu0 %v1547_v60  ;;  %v589_v60 = vld [vmem:[#allocation5 + $0xfa0] sm:$0xff] }
 0x132   :  { %1804 = vmatpush1.bf16.msra.mxu1 %v1803_v61  ;;  %1550 = vmatprep.subr.bf16.mxu0 %v1549_v62  ;;  %v587_v61 = vld [vmem:[#allocation5 + $0xf90] sm:$0xff]  ;;  %v1825_v62 = vpack.c.bf16 %v592_v55, %v588_v54  ;;  %v1571_v4 = vpack.c.bf16 %v589_v60, %v585_v59 }
 0x133   :  { %1806 = vmatprep.subr.bf16.mxu1 %v1805_v2  ;;  %v596_v2 = vld [vmem:[#allocation5 + $0xfd8] sm:$0xff]  ;;  %v1827_v5 = vpack.c.bf16 %v591_v63, %v587_v61 }
 0x135   :  { %1552 = vmatpush1.bf16.msra.mxu0 %v1551_v8  ;;  %v597_v8 = vld [vmem:[#allocation5 + $0xfe0] sm:$0xff] }
 0x136   :  { %1808 = vmatpush1.bf16.msra.mxu1 %v1807_v9  ;;  %1554 = vmatprep.subr.bf16.mxu0 %v1553_v10  ;;  %v1829_v9 = vpack.c.bf16 %v600_v3, %v596_v2  ;;  %v595_v10 = vld [vmem:[#allocation5 + $0xfd0] sm:$0xff]  ;;  %v1575_v12 = vpack.c.bf16 %v597_v8, %v593_v7  ;;  %v1318_v7 = vld [vmem:[#allocation2] ss:$0 sm:$0xff] }
 0x137   :  { %1810 = vmatprep.subr.bf16.mxu1 %v1809_v14  ;;  %v1831_v13 = vpack.c.bf16 %v599_v11, %v595_v10  ;;  %v79_v14 = vld [vmem:[#allocation3 + $0x30] sm:$0xff] }
 0x139   :  { %1556 = vmatpush1.bf16.msra.mxu0 %v1555_v20  ;;  %v601_v20 = vld [vmem:[#allocation7] sm:$0xf] }
 0x13a   :  { %1812 = vmatpush1.bf16.msra.mxu1 %v1811_v21  ;;  %1558 = vmatprep.subr.bf16.mxu0 %v1557_v22  ;;  %v613_v21 = vsub.s32 2, %v604_v18  ;;  %v609_v22 = vsub.s32 1, %v604_v18  ;;  %v606_v24 = vrot.slane %v601_v20, %v605_v19  ;;  %v618_v28 = vrot.slane %v601_v20, %v617_v23 }
 0x13b   :  { %1814 = vmatprep.subr.bf16.mxu1 %v1813_v26 }
 0x13c   :  { %v614_v26 = vrot.slane %v601_v20, %v613_v21  ;;  %v610_v27 = vrot.slane %v601_v20, %v609_v22  ;;  %v1256_v36 = vrot.slane %v1247_v25, %v609_v22  ;;  %v1260_v41 = vrot.slane %v1247_v25, %v613_v21 }
 0x13d   :  { %1560 = vmatpush1.bf16.msra.mxu0 %v1559_v32 }
 0x13e   :  { %1816 = vmatpush1.bf16.msra.mxu1 %v1815_v33  ;;  %1562 = vmatprep.subr.bf16.mxu0 %v1561_v34 }
 0x13f   :  { %1818 = vmatprep.subr.bf16.mxu1 %v1817_v38 }
 0x141   :  { %1564 = vmatpush1.bf16.msra.mxu0 %v1563_v44 }
 0x142   :  { %1820 = vmatpush1.bf16.msra.mxu1 %v1819_v45  ;;  %1566 = vmatprep.subr.bf16.mxu0 %v1565_v46 }
 0x143   :  { %1822 = vmatprep.subr.bf16.mxu1 %v1821_v50 }
 0x145   :  { %1568 = vmatpush1.bf16.msra.mxu0 %v1567_v56 }
 0x146   :  { %1824 = vmatpush1.bf16.msra.mxu1 %v1823_v57  ;;  %1570 = vmatprep.subr.bf16.mxu0 %v1569_v58 }
 0x147   :  { %1826 = vmatprep.subr.bf16.mxu1 %v1825_v62 }
 0x149   :  { %1572 = vmatpush1.bf16.msra.mxu0 %v1571_v4 }
 0x14a   :  { %1828 = vmatpush1.bf16.msra.mxu1 %v1827_v5  ;;  %1574 = vmatprep.subr.bf16.mxu0 %v1573_v6 }
 0x14b   :  { %1830 = vmatprep.subr.bf16.mxu1 %v1829_v9 }
 0x14d   :  { %1576 = vmatpush1.bf16.msra.mxu0 %v1575_v12 }
 0x14e   :  { %1832 = vmatpush1.bf16.msra.mxu1 %v1831_v13 }
 0x150   :  { %919 = vmatmul.mubr.f32.vlgmr.msra.gmra.mrb[0].mxu0 %v79_v14 }
 0x151   :  { %1227 = vmatmul.mubr.f32.vlgmr.msra.gmra.mrb[0].mxu1 %v79_v14  ;;  %924 = vmatprep.mubr.f32.mxu0 %v88_v15 }
 0x152   :  { %1232 = vmatprep.mubr.f32.mxu1 %v88_v15 }
 0x154   :  { %925 = vmatmul.mubr.f32.gmra.mrb[2].mxu0 %v87_v16 }
 0x155   :  { %1233 = vmatmul.mubr.f32.gmra.mrb[2].mxu1 %v87_v16 }
 0x223   :  { %v920_v29 = vpop.f32.mrb[0].mxu0 }
 0x224   :  { %v1833_v30 = vadd.f32 %v920_v29, %v606_v24  ;;  %v1228_v32 = vpop.f32.mrb[0].mxu1  ;;  %v922_v33 = vpop.f32.mrb[1].mxu0 }
 0x225   :  { %v1837_v34 = vadd.f32 %v1228_v32, %v614_v26  ;;  %v1834_v35 = vadd.f32 %v922_v33, %v610_v27  ;;  %v1230_v37 = vpop.f32.mrb[1].mxu1 }
 0x226   :  { %v1239_v38 = vmax.f32 %v1833_v30, 0.0  ;;  %v1838_v39 = vadd.f32 %v1230_v37, %v618_v28 }
 0x227   :  { %v1241_v40 = vmax.f32 %v1837_v34, 0.0  ;;  %v1240_v42 = vmax.f32 %v1834_v35, 0.0  ;;  %v926_v43 = vpop.f32.mrb[2].mxu0 }
 0x228   :  { %v1269_v44 = vmul.f32 %v1252_v31, %v1239_v38  ;;  %v1835_v45 = vadd.f32 %v926_v43, %v606_v24  ;;  %v1234_v46 = vpop.f32.mrb[2].mxu1  ;;  %v928_v47 = vpop.f32.mrb[3].mxu0  ;;  %v1242_v50 = vmax.f32 %v1838_v39, 0.0 }
 0x229   :  { %v1270_v49 = vmul.f32 %v1256_v36, %v1240_v42  ;;  %v1839_v51 = vadd.f32 %v1234_v46, %v614_v26  ;;  %v1836_v52 = vadd.f32 %v928_v47, %v610_v27  ;;  %v1236_v53 = vpop.f32.mrb[3].mxu1  ;;  %v1271_v56 = vmul.f32 %v1260_v41, %v1241_v40 }
 0x22a   :  { %v1243_v54 = vmax.f32 %v1835_v45, 0.0  ;;  %v1840_v55 = vadd.f32 %v1236_v53, %v618_v28  ;;  %v1272_v63 = vmul.f32 %v1264_v48, %v1242_v50 }
 0x22b   :  { %v1245_v57 = vmax.f32 %v1839_v51, 0.0  ;;  %v1244_v58 = vmax.f32 %v1836_v52, 0.0  ;;  %v1277_v59 = vadd.f32 %v1270_v49, %v1269_v44 }
 0x22c   :  { %v1273_v60 = vmul.f32 %v1252_v31, %v1243_v54  ;;  %v1246_v62 = vmax.f32 %v1840_v55, 0.0 }
 0x22d   :  { %v1274_v61 = vmul.f32 %v1256_v36, %v1244_v58  ;;  %v1278_v0 = vadd.f32 %v1277_v59, %v1271_v56  ;;  %v1275_v1 = vmul.f32 %v1260_v41, %v1245_v57 }
 0x22e   :  { %v1276_v4 = vmul.f32 %v1264_v48, %v1246_v62 }
 0x22f   :  { %v1282_v2 = vadd.f32 %v1274_v61, %v1273_v60  ;;  %v1279_v3 = vadd.f32 %v1278_v0, %v1272_v63 }
 0x231   :  { %1280 = vadd.xlane.f32.xlu0 %v1279_v3  ;;  %v1283_v5 = vadd.f32 %v1282_v2, %v1275_v1 }
 0x233   :  { %v1284_v6 = vadd.f32 %v1283_v5, %v1276_v4 }
 0x235   :  { %1285 = vadd.xlane.f32.xlu0 %v1284_v6 }
 0x2be   :  { %v1281_v8 = vpop.xlane.xlu0 %1280 }
 0x2bf   :  { %v1294_v9 = vadd.f32 %v1318_v7, %v1281_v8 }
 0x2c1   :  { %v1319_v10 = vmul.f32 -1.442695, %v1294_v9 }
 0x2c2   :  { %v1286_v11 = vpop.xlane.xlu0 %1285 }
 0x2c3   :  { %1873 = vpow2.f32 %v1319_v10  ;;  %v1295_v12 = vadd.f32 %v1318_v7, %v1286_v11 }
 0x2c5   :  { %v1320_v13 = vmul.f32 -1.442695, %v1295_v12 }
 0x2c7   :  { %1875 = vpow2.f32 %v1320_v13 }
 0x2cd   :  { %v1874_v14 = vpop.eup %1873 }
 0x2ce   :  { %v1302_v15 = vadd.f32 1.0, %v1874_v14 }
 0x2d0   :  { %1877 = vrcp.f32 %v1302_v15 }
 0x2d1   :  { %v1876_v16 = vpop.eup %1875 }
 0x2d2   :  { %v1303_v17 = vadd.f32 1.0, %v1876_v16 }
 0x2d4   :  { %1879 = vrcp.f32 %v1303_v17 }
 0x2da   :  { %v1878_v18 = vpop.eup %1877 }
 0x2db   :  { %1309 = vst.msk [vmem:[%s2075_s5] sm:$0xff] %vm1308_vm0, %v1878_v18 }
 0x2de   :  { %v1880_v19 = vpop.eup %1879 }
 0x2df   :  { %1310 = vst.msk [vmem:[%s2075_s5 + $0x8] sm:$0xff] %vm1308_vm0, %v1880_v19 }
 0x2e0   :  { %1315 = vsyncpa [#allocation4], 1 }
 0x2e1   :  { %1316 = vsyncpa [#allocation6], 1 }
 0x2e2   :  { %1317 = vsyncpa [#allocation9], 1 }

</bundles_post_ra>
